<compile_context>
chip_gen: v5e
topology: v5e:2x2
jax: 0.10.0
libtpu: 0.0.40
codegen_flags: <defaults>
</compile_context>

<pallas_src>
import numpy as np
import jax
import jax.numpy as jnp
from jax import lax
from jax.experimental import pallas as pl
from jax.experimental.pallas import tpu as pltpu

# ------------------------- small synthetic config -------------------------
B = 2            # batch of sentences
S = 16           # tokenizer max_length (token sequence length)
D = 32           # d_model (BERT hidden size)
H = 4            # attention heads
DH = D // H      # head dim
FF = 64          # FFN intermediate size
V = 64           # vocab size
W = 8            # max_word_length (word-level output length)
BS = B * S       # stacked token rows
BW = B * W       # stacked word rows
SCALE = float(1.0 / np.sqrt(DH))
NEG_INF = -1e9


def _layernorm(x, g, b, eps=1e-12):
    mu = jnp.mean(x, axis=-1, keepdims=True)
    var = jnp.mean(jnp.square(x - mu), axis=-1, keepdims=True)
    return (x - mu) * lax.rsqrt(var + eps) * g + b


# ------------------------------ fused kernel ---------------------------------
def pref_encoder_kernel(ids_ref, tt_ref, mask_ref, sent_col_ref, sent_row_ref, gwid_ref,
                        wemb_ref, pos_ref, type_ref, g_emb_ref, b_emb_ref,
                        wqkv_ref, bqkv_ref, wo_ref, bo_ref, g1_ref, b1_ref,
                        w_ff1_ref, b_ff1_ref, w_ff2_ref, b_ff2_ref, g2_ref, b2_ref,
                        out_ref):
    """Whole batch in one invocation: embeddings + 1 BERT layer + token->word mean agg."""
    # ---- embeddings: one-hot gather on the MXU (fine at V=64; use a DMA gather for real vocab) ----
    ids = ids_ref[...]                                              # (BS, 1) int32
    vocab_iota = lax.broadcasted_iota(jnp.int32, (BS, V), 1)
    onehot = (vocab_iota == ids).astype(jnp.bfloat16)               # direct bf16 one-hot
    tok_emb = jnp.dot(onehot, wemb_ref[...],
                      preferred_element_type=jnp.float32)           # (BS, D) f32
    tt = tt_ref[...]                                                # (BS, 1) int32
    type_emb = jnp.where(tt == 0, type_ref[0:1, :], type_ref[1:2, :])
    pos = jnp.concatenate([pos_ref[...]] * B, axis=0)               # (BS, D), replicated in VMEM
    x = tok_emb + pos + type_emb                                    # (BS, D) f32

    y = _layernorm(x, g_emb_ref[...], b_emb_ref[...])               # (BS, D) f32

    # ---- multi-head self-attention ----
    # one lane-dense QKV matmul: (BS, D) x (D, 3D)
    y_bf = y.astype(jnp.bfloat16)
    qkv = jnp.dot(y_bf, wqkv_ref[...],
                  preferred_element_type=jnp.float32) + bqkv_ref[...]   # (BS, 3D) f32
    q, k, v = qkv[:, 0:D], qkv[:, D:2 * D], qkv[:, 2 * D:3 * D]

    # additive bias built in-kernel: same-sentence block-diagonal AND valid (unpadded) key
    allowed = (sent_col_ref[...] == sent_row_ref[...]) & (mask_ref[...] > 0.5)
    bias = jnp.where(allowed, 0.0, NEG_INF).astype(jnp.float32)     # (BS, BS) f32

    ctx_heads = []
    for h in range(H):                                              # static, H = 4
        sl = slice(h * DH, (h + 1) * DH)
        qh, kh, vh = q[:, sl], k[:, sl], v[:, sl]                   # (BS, DH) f32 each
        s = lax.dot_general(qh, kh, (((1,), (1,)), ((), ())),       # q @ k^T, no explicit .T
                            preferred_element_type=jnp.float32) * SCALE + bias
        s_max = jnp.max(s, axis=-1, keepdims=True)
        e = jnp.exp(s - s_max)
        p = e * pl.reciprocal(jnp.sum(e, axis=-1, keepdims=True), approx=True)
        ctx_heads.append(jnp.dot(p, vh, preferred_element_type=jnp.float32))
    ctx = jnp.concatenate(ctx_heads, axis=-1)                       # (BS, D) f32, head-major

    # one lane-dense output projection: (BS, D) x (D, D)
    attn = jnp.dot(ctx.astype(jnp.bfloat16), wo_ref[...],
                   preferred_element_type=jnp.float32) + bo_ref[...]

    x1 = _layernorm(y + attn, g1_ref[...], b1_ref[...])

    # ---- FFN on stacked (B*S, D) activations, bf16 in / f32 accumulate ----
    # TODO(synk): HF BERT uses exact erf GELU; tanh-approx kept here (matches the reference).
    h_mid = jax.nn.gelu(jnp.dot(x1.astype(jnp.bfloat16), w_ff1_ref[...],
                                preferred_element_type=jnp.float32) + b_ff1_ref[...])
    ffo = jnp.dot(h_mid.astype(jnp.bfloat16), w_ff2_ref[...],
                  preferred_element_type=jnp.float32) + b_ff2_ref[...]
    hid = _layernorm(x1 + ffo, g2_ref[...], b2_ref[...])            # (BS, D) f32

    # ---- fused token -> word mean aggregation (global word ids precomputed outside) ----
    gwid = gwid_ref[...]                                            # (1, BS) int32, -1 = CLS/SEP/PAD
    rows = lax.broadcasted_iota(jnp.int32, (BW, BS), 0)             # global word index per row
    assign = (rows == gwid).astype(jnp.float32)                     # (BW, BS) one-hot
    counts = jnp.sum(assign, axis=-1, keepdims=True)                # (BW, 1)
    sums = jnp.dot(assign, hid, preferred_element_type=jnp.float32) # (BW, D)
    out_ref[...] = sums / jnp.maximum(counts, 1.0)                  # zero rows for absent words


# ------------------------------ wrapper ---------------------------------------
def build_kernel_inputs(params, input_ids, attn_mask, word_ids, token_type):
    """Index/layout glue + weight preprocessing (bf16 casts for MXU operands only)."""
    bf = jnp.bfloat16
    ids_col = input_ids.reshape(BS, 1).astype(jnp.int32)
    tt_col = token_type.reshape(BS, 1).astype(jnp.int32)
    mask_row = attn_mask.reshape(1, BS).astype(jnp.float32)

    # per-token sentence id, as column and row vectors (kernel builds the (BS,BS) bias itself)
    sent = jnp.repeat(jnp.arange(B, dtype=jnp.int32), S)
    sent_col = sent.reshape(BS, 1)
    sent_row = sent.reshape(1, BS)

    # global word index b*W + w per token (-1 for CLS/SEP/PAD)
    wid = word_ids.astype(jnp.int32)
    gwid = jnp.where(wid >= 0, wid + W * jnp.arange(B, dtype=jnp.int32)[:, None], -1)
    gwid_row = gwid.reshape(1, BS)

    return (ids_col, tt_col, mask_row, sent_col, sent_row, gwid_row,
            params["word_emb"].astype(bf), params["pos_emb"], params["type_emb"],
            params["g_emb"], params["b_emb"],
            params["wqkv"].astype(bf), params["bqkv"],
            params["wo"].astype(bf), params["bo"],
            params["g1"], params["b1"],
            params["w_ff1"].astype(bf), params["b_ff1"],
            params["w_ff2"].astype(bf), params["b_ff2"],
            params["g2"], params["b2"])


@jax.jit
def pref_encoder_forward(params, input_ids, attn_mask, word_ids, token_type):
    args = build_kernel_inputs(params, input_ids, attn_mask, word_ids, token_type)
    vmem = pl.BlockSpec(memory_space=pltpu.MemorySpace.VMEM)
    out = pl.pallas_call(
        pref_encoder_kernel,
        out_shape=jax.ShapeDtypeStruct((BW, D), jnp.float32),
        in_specs=[vmem] * len(args),       # whole (toy-sized) arrays in VMEM, single grid step
        out_specs=vmem,
    )(*args)
    return out.reshape(B, W, D)            # [batch, max_word_length, d_model]


# -------------------------- params & synthetic tokens -------------------------
def init_params(key):
    ks = jax.random.split(key, 7)
    nrm = lambda k, shp: (0.02 * jax.random.normal(k, shp)).astype(jnp.float32)
    ones = lambda shp: jnp.ones(shp, jnp.float32)
    zeros = lambda shp: jnp.zeros(shp, jnp.float32)
    return {
        "word_emb": nrm(ks[0], (V, D)),
        "pos_emb": nrm(ks[1], (S, D)),
        "type_emb": nrm(ks[2], (2, D)),
        "g_emb": ones((1, D)), "b_emb": zeros((1, D)),
        "wqkv": nrm(ks[3], (D, 3 * D)), "bqkv": zeros((1, 3 * D)),
        "wo": nrm(ks[4], (D, D)), "bo": zeros((1, D)),
        "g1": ones((1, D)), "b1": zeros((1, D)),
        "w_ff1": nrm(ks[5], (D, FF)), "b_ff1": zeros((1, FF)),
        "w_ff2": nrm(ks[6], (FF, D)), "b_ff2": zeros((1, D)),
        "g2": ones((1, D)), "b2": zeros((1, D)),
    }


def synthetic_tokenize(batch_size):
    # TODO(synk): the real HF tokenizer (string -> subword ids / word_ids) has no kernel
    # equivalent; this produces deterministic equivalent integer inputs.
    rng = np.random.default_rng(0)
    input_ids = np.zeros((batch_size, S), dtype=np.int32)
    attn_mask = np.zeros((batch_size, S), dtype=np.float32)
    word_ids = np.full((batch_size, S), -1, dtype=np.int32)
    token_type = np.zeros((batch_size, S), dtype=np.int32)
    CLS, SEP = 1, 2
    for b in range(batch_size):
        n_words = 4 + b
        pos = 0
        input_ids[b, pos] = CLS; attn_mask[b, pos] = 1.0; pos += 1
        for w in range(n_words):
            n_sub = 1 + ((b + w) % 2)          # 1 or 2 sub-word tokens per word
            for _ in range(n_sub):
                input_ids[b, pos] = int(rng.integers(3, V))
                attn_mask[b, pos] = 1.0
                word_ids[b, pos] = w
                pos += 1
        input_ids[b, pos] = SEP; attn_mask[b, pos] = 1.0; pos += 1
    return input_ids, attn_mask, word_ids, token_type


# ------------------------------ pure-JAX reference ----------------------------
def reference(params, input_ids, attn_mask, word_ids, token_type):
    bf, f32 = jnp.bfloat16, jnp.float32
    hp = lax.Precision.HIGHEST
    p = params

    def ln(x, g, b, eps=1e-12):
        mu = jnp.mean(x, axis=-1, keepdims=True)
        var = jnp.mean(jnp.square(x - mu), axis=-1, keepdims=True)
        return (x - mu) * lax.rsqrt(var + eps) * g + b

    emb = (p["word_emb"].astype(bf).astype(f32)[input_ids]
           + p["pos_emb"][None, :, :]
           + p["type_emb"][token_type])
    y = ln(emb, p["g_emb"], p["b_emb"])
    qkv = jnp.dot(y.astype(bf), p["wqkv"].astype(bf), preferred_element_type=f32) + p["bqkv"]
    q, k, v = qkv[..., :D], qkv[..., D:2 * D], qkv[..., 2 * D:]
    qh = q.reshape(B, S, H, DH).transpose(0, 2, 1, 3)
    kh = k.reshape(B, S, H, DH).transpose(0, 2, 1, 3)
    vh = v.reshape(B, S, H, DH).transpose(0, 2, 1, 3)
    s = jnp.einsum("bhqd,bhkd->bhqk", qh, kh, precision=hp) * SCALE
    s = s + (attn_mask[:, None, None, :] - 1.0) * 1e9
    pm = jax.nn.softmax(s, axis=-1)
    ctx = jnp.einsum("bhqk,bhkd->bhqd", pm, vh, precision=hp).transpose(0, 2, 1, 3).reshape(B, S, D)
    attn = jnp.dot(ctx.astype(bf), p["wo"].astype(bf), preferred_element_type=f32) + p["bo"]
    x1 = ln(y + attn, p["g1"], p["b1"])
    h_mid = jax.nn.gelu(jnp.dot(x1.astype(bf), p["w_ff1"].astype(bf),
                                preferred_element_type=f32) + p["b_ff1"])
    ffo = jnp.dot(h_mid.astype(bf), p["w_ff2"].astype(bf), preferred_element_type=f32) + p["b_ff2"]
    hid = ln(x1 + ffo, p["g2"], p["b2"])
    assign = (word_ids[:, None, :] == jnp.arange(W)[None, :, None]).astype(f32)
    counts = assign.sum(axis=-1, keepdims=True)
    sums = jnp.einsum("bws,bsd->bwd", assign, hid, precision=hp)
    return sums / jnp.maximum(counts, 1.0)


# ----------------------------------- main --------------------------------------
if __name__ == "__main__":
    key = jax.random.PRNGKey(0)
    params = init_params(key)

    ids_np, mask_np, wid_np, tt_np = synthetic_tokenize(B)
    input_ids = jnp.asarray(ids_np)
    attn_mask = jnp.asarray(mask_np)
    word_ids = jnp.asarray(wid_np)
    token_type = jnp.asarray(tt_np)

    word_embeddings = pref_encoder_forward(params, input_ids, attn_mask, word_ids, token_type)
    word_embeddings = jax.block_until_ready(word_embeddings)

    ref = jax.block_until_ready(reference(params, input_ids, attn_mask, word_ids, token_type))
    np.testing.assert_allclose(np.asarray(word_embeddings), np.asarray(ref),
                               rtol=2e-3, atol=2e-3)
    assert word_embeddings.shape == (B, W, D)
    print("KERNEL_OK")
</pallas_src>

<mosaic_0001>
module attributes {stable_mosaic.version = 11 : i64} {
  func.func @pref_encoder_kernel(%arg0: memref<32x1xi32, #tpu.memory_space<vmem>>, %arg1: memref<32x1xi32, #tpu.memory_space<vmem>>, %arg2: memref<1x32xf32, #tpu.memory_space<vmem>>, %arg3: memref<32x1xi32, #tpu.memory_space<vmem>>, %arg4: memref<1x32xi32, #tpu.memory_space<vmem>>, %arg5: memref<1x32xi32, #tpu.memory_space<vmem>>, %arg6: memref<64x32xbf16, #tpu.memory_space<vmem>>, %arg7: memref<16x32xf32, #tpu.memory_space<vmem>>, %arg8: memref<2x32xf32, #tpu.memory_space<vmem>>, %arg9: memref<1x32xf32, #tpu.memory_space<vmem>>, %arg10: memref<1x32xf32, #tpu.memory_space<vmem>>, %arg11: memref<32x96xbf16, #tpu.memory_space<vmem>>, %arg12: memref<1x96xf32, #tpu.memory_space<vmem>>, %arg13: memref<32x32xbf16, #tpu.memory_space<vmem>>, %arg14: memref<1x32xf32, #tpu.memory_space<vmem>>, %arg15: memref<1x32xf32, #tpu.memory_space<vmem>>, %arg16: memref<1x32xf32, #tpu.memory_space<vmem>>, %arg17: memref<32x64xbf16, #tpu.memory_space<vmem>>, %arg18: memref<1x64xf32, #tpu.memory_space<vmem>>, %arg19: memref<64x32xbf16, #tpu.memory_space<vmem>>, %arg20: memref<1x32xf32, #tpu.memory_space<vmem>>, %arg21: memref<1x32xf32, #tpu.memory_space<vmem>>, %arg22: memref<1x32xf32, #tpu.memory_space<vmem>>, %arg23: memref<16x32xf32, #tpu.memory_space<vmem>>) attributes {dimension_semantics = [], scalar_prefetch = 0 : i64, scratch_operands = 0 : i64, tpu.core_type = #tpu.core_type<tc>} {
    %c0 = arith.constant 0 : index
    %c0_0 = arith.constant 0 : index
    %0 = vector.load %arg0[%c0, %c0_0] : memref<32x1xi32, #tpu.memory_space<vmem>>, vector<32x1xi32>
    %1 = tpu.iota {dimensions = array<i32: 1>} : vector<32x64xi32>
    %2 = vector.broadcast %0 : vector<32x1xi32> to vector<32x64xi32>
    %3 = arith.cmpi eq, %1, %2 : vector<32x64xi32>
    %4 = arith.extui %3 : vector<32x64xi1> to vector<32x64xi32>
    %5 = arith.sitofp %4 : vector<32x64xi32> to vector<32x64xf32>
    %6 = arith.truncf %5 : vector<32x64xf32> to vector<32x64xbf16>
    %c0_1 = arith.constant 0 : index
    %c0_2 = arith.constant 0 : index
    %7 = vector.load %arg6[%c0_1, %c0_2] : memref<64x32xbf16, #tpu.memory_space<vmem>>, vector<64x32xbf16>
    %cst = arith.constant dense<0.000000e+00> : vector<32x32xf32>
    %8 = tpu.matmul %6, %7, %cst {dimension_numbers = #tpu.dot_dimension_numbers<[1], [0], [0], [1], [0, 0, 1, 1], [], []>} : vector<32x64xbf16>, vector<64x32xbf16>, vector<32x32xf32> -> vector<32x32xf32>
    %c0_3 = arith.constant 0 : index
    %c0_4 = arith.constant 0 : index
    %9 = vector.load %arg1[%c0_3, %c0_4] : memref<32x1xi32, #tpu.memory_space<vmem>>, vector<32x1xi32>
    %c0_i32 = arith.constant 0 : i32
    %10 = vector.broadcast %c0_i32 : i32 to vector<32x1xi32>
    %11 = arith.cmpi eq, %9, %10 : vector<32x1xi32>
    %c0_5 = arith.constant 0 : index
    %c0_6 = arith.constant 0 : index
    %12 = vector.load %arg8[%c0_5, %c0_6] : memref<2x32xf32, #tpu.memory_space<vmem>>, vector<1x32xf32>
    %c1 = arith.constant 1 : index
    %c0_7 = arith.constant 0 : index
    %13 = vector.load %arg8[%c1, %c0_7] : memref<2x32xf32, #tpu.memory_space<vmem>>, vector<1x32xf32>
    %14 = vector.shape_cast %11 : vector<32x1xi1> to vector<32x1xi1>
    %15 = vector.broadcast %14 : vector<32x1xi1> to vector<32x32xi1>
    %16 = vector.shape_cast %12 : vector<1x32xf32> to vector<1x32xf32>
    %17 = vector.broadcast %16 : vector<1x32xf32> to vector<32x32xf32>
    %18 = vector.shape_cast %13 : vector<1x32xf32> to vector<1x32xf32>
    %19 = vector.broadcast %18 : vector<1x32xf32> to vector<32x32xf32>
    %20 = arith.select %15, %17, %19 : vector<32x32xi1>, vector<32x32xf32>
    %c0_8 = arith.constant 0 : index
    %c0_9 = arith.constant 0 : index
    %21 = vector.load %arg7[%c0_8, %c0_9] : memref<16x32xf32, #tpu.memory_space<vmem>>, vector<16x32xf32>
    %22 = tpu.concatenate %21, %21 in 0 : vector<16x32xf32>, vector<16x32xf32> -> vector<32x32xf32>
    %23 = arith.addf %8, %22 : vector<32x32xf32>
    %24 = arith.addf %23, %20 : vector<32x32xf32>
    %c0_10 = arith.constant 0 : index
    %c0_11 = arith.constant 0 : index
    %25 = vector.load %arg9[%c0_10, %c0_11] : memref<1x32xf32, #tpu.memory_space<vmem>>, vector<1x32xf32>
    %c0_12 = arith.constant 0 : index
    %c0_13 = arith.constant 0 : index
    %26 = vector.load %arg10[%c0_12, %c0_13] : memref<1x32xf32, #tpu.memory_space<vmem>>, vector<1x32xf32>
    %cst_14 = arith.constant dense<0.000000e+00> : vector<32xf32>
    %27 = vector.multi_reduction <add>, %24, %cst_14 [1] : vector<32x32xf32> to vector<32xf32>
    %28 = vector.shape_cast %27 : vector<32xf32> to vector<32x1xf32>
    %cst_15 = arith.constant 3.200000e+01 : f32
    %29 = vector.broadcast %cst_15 : f32 to vector<32x1xf32>
    %30 = arith.divf %28, %29 : vector<32x1xf32>
    %31 = vector.broadcast %30 : vector<32x1xf32> to vector<32x32xf32>
    %32 = arith.subf %24, %31 : vector<32x32xf32>
    %33 = arith.mulf %32, %32 : vector<32x32xf32>
    %cst_16 = arith.constant dense<0.000000e+00> : vector<32xf32>
    %34 = vector.multi_reduction <add>, %33, %cst_16 [1] : vector<32x32xf32> to vector<32xf32>
    %35 = vector.shape_cast %34 : vector<32xf32> to vector<32x1xf32>
    %cst_17 = arith.constant 3.200000e+01 : f32
    %36 = vector.broadcast %cst_17 : f32 to vector<32x1xf32>
    %37 = arith.divf %35, %36 : vector<32x1xf32>
    %38 = vector.broadcast %30 : vector<32x1xf32> to vector<32x32xf32>
    %39 = arith.subf %24, %38 : vector<32x32xf32>
    %cst_18 = arith.constant 9.99999996E-13 : f32
    %40 = vector.broadcast %cst_18 : f32 to vector<32x1xf32>
    %41 = arith.addf %37, %40 : vector<32x1xf32>
    %42 = math.rsqrt %41 : vector<32x1xf32>
    %43 = vector.broadcast %42 : vector<32x1xf32> to vector<32x32xf32>
    %44 = arith.mulf %39, %43 : vector<32x32xf32>
    %45 = vector.broadcast %25 : vector<1x32xf32> to vector<32x32xf32>
    %46 = arith.mulf %44, %45 : vector<32x32xf32>
    %47 = vector.broadcast %26 : vector<1x32xf32> to vector<32x32xf32>
    %48 = arith.addf %46, %47 : vector<32x32xf32>
    %49 = arith.truncf %48 : vector<32x32xf32> to vector<32x32xbf16>
    %c0_19 = arith.constant 0 : index
    %c0_20 = arith.constant 0 : index
    %50 = vector.load %arg11[%c0_19, %c0_20] : memref<32x96xbf16, #tpu.memory_space<vmem>>, vector<32x96xbf16>
    %cst_21 = arith.constant dense<0.000000e+00> : vector<32x96xf32>
    %51 = tpu.matmul %49, %50, %cst_21 {dimension_numbers = #tpu.dot_dimension_numbers<[1], [0], [0], [1], [0, 0, 1, 1], [], []>} : vector<32x32xbf16>, vector<32x96xbf16>, vector<32x96xf32> -> vector<32x96xf32>
    %c0_22 = arith.constant 0 : index
    %c0_23 = arith.constant 0 : index
    %52 = vector.load %arg12[%c0_22, %c0_23] : memref<1x96xf32, #tpu.memory_space<vmem>>, vector<1x96xf32>
    %53 = vector.broadcast %52 : vector<1x96xf32> to vector<32x96xf32>
    %54 = arith.addf %51, %53 : vector<32x96xf32>
    %55 = vector.extract_strided_slice %54 {offsets = [0, 0], sizes = [32, 32], strides = [1, 1]} : vector<32x96xf32> to vector<32x32xf32>
    %56 = vector.extract_strided_slice %54 {offsets = [0, 32], sizes = [32, 32], strides = [1, 1]} : vector<32x96xf32> to vector<32x32xf32>
    %57 = vector.extract_strided_slice %54 {offsets = [0, 64], sizes = [32, 32], strides = [1, 1]} : vector<32x96xf32> to vector<32x32xf32>
    %c0_24 = arith.constant 0 : index
    %c0_25 = arith.constant 0 : index
    %58 = vector.load %arg3[%c0_24, %c0_25] : memref<32x1xi32, #tpu.memory_space<vmem>>, vector<32x1xi32>
    %c0_26 = arith.constant 0 : index
    %c0_27 = arith.constant 0 : index
    %59 = vector.load %arg4[%c0_26, %c0_27] : memref<1x32xi32, #tpu.memory_space<vmem>>, vector<1x32xi32>
    %60 = vector.broadcast %58 : vector<32x1xi32> to vector<32x32xi32>
    %61 = vector.broadcast %59 : vector<1x32xi32> to vector<32x32xi32>
    %62 = arith.cmpi eq, %60, %61 : vector<32x32xi32>
    %c0_28 = arith.constant 0 : index
    %c0_29 = arith.constant 0 : index
    %63 = vector.load %arg2[%c0_28, %c0_29] : memref<1x32xf32, #tpu.memory_space<vmem>>, vector<1x32xf32>
    %cst_30 = arith.constant 5.000000e-01 : f32
    %64 = vector.broadcast %cst_30 : f32 to vector<1x32xf32>
    %65 = arith.cmpf ogt, %63, %64 : vector<1x32xf32>
    %66 = vector.broadcast %65 : vector<1x32xi1> to vector<32x32xi1>
    %67 = arith.andi %62, %66 : vector<32x32xi1>
    %cst_31 = arith.constant 0.000000e+00 : f32
    %cst_32 = arith.constant -1.000000e+09 : f32
    %68 = vector.broadcast %cst_31 : f32 to vector<32x32xf32>
    %69 = vector.broadcast %cst_32 : f32 to vector<32x32xf32>
    %70 = arith.select %67, %68, %69 : vector<32x32xi1>, vector<32x32xf32>
    %71 = vector.extract_strided_slice %55 {offsets = [0, 0], sizes = [32, 8], strides = [1, 1]} : vector<32x32xf32> to vector<32x8xf32>
    %72 = vector.extract_strided_slice %56 {offsets = [0, 0], sizes = [32, 8], strides = [1, 1]} : vector<32x32xf32> to vector<32x8xf32>
    %73 = vector.extract_strided_slice %57 {offsets = [0, 0], sizes = [32, 8], strides = [1, 1]} : vector<32x32xf32> to vector<32x8xf32>
    %cst_33 = arith.constant dense<0.000000e+00> : vector<32x32xf32>
    %74 = tpu.matmul %71, %72, %cst_33 {dimension_numbers = #tpu.dot_dimension_numbers<[1], [1], [0], [0], [0, 0, 1, 0], [], []>} : vector<32x8xf32>, vector<32x8xf32>, vector<32x32xf32> -> vector<32x32xf32>
    %cst_34 = arith.constant 0.353553385 : f32
    %75 = vector.broadcast %cst_34 : f32 to vector<32x32xf32>
    %76 = arith.mulf %74, %75 : vector<32x32xf32>
    %77 = arith.addf %76, %70 : vector<32x32xf32>
    %cst_35 = arith.constant dense<0xFF800000> : vector<32xf32>
    %78 = vector.multi_reduction <maximumf>, %77, %cst_35 [1] : vector<32x32xf32> to vector<32xf32>
    %79 = vector.shape_cast %78 : vector<32xf32> to vector<32x1xf32>
    %80 = vector.broadcast %79 : vector<32x1xf32> to vector<32x32xf32>
    %81 = arith.subf %77, %80 : vector<32x32xf32>
    %82 = math.exp %81 : vector<32x32xf32>
    %cst_36 = arith.constant dense<0.000000e+00> : vector<32xf32>
    %83 = vector.multi_reduction <add>, %82, %cst_36 [1] : vector<32x32xf32> to vector<32xf32>
    %84 = vector.shape_cast %83 : vector<32xf32> to vector<32x1xf32>
    %85 = tpu.reciprocal %84 {approx = true} : vector<32x1xf32> -> vector<32x1xf32>
    %86 = vector.broadcast %85 : vector<32x1xf32> to vector<32x32xf32>
    %87 = arith.mulf %82, %86 : vector<32x32xf32>
    %cst_37 = arith.constant dense<0.000000e+00> : vector<32x8xf32>
    %88 = tpu.matmul %87, %73, %cst_37 {dimension_numbers = #tpu.dot_dimension_numbers<[1], [0], [0], [1], [0, 0, 1, 1], [], []>} : vector<32x32xf32>, vector<32x8xf32>, vector<32x8xf32> -> vector<32x8xf32>
    %89 = vector.extract_strided_slice %55 {offsets = [0, 8], sizes = [32, 8], strides = [1, 1]} : vector<32x32xf32> to vector<32x8xf32>
    %90 = vector.extract_strided_slice %56 {offsets = [0, 8], sizes = [32, 8], strides = [1, 1]} : vector<32x32xf32> to vector<32x8xf32>
    %91 = vector.extract_strided_slice %57 {offsets = [0, 8], sizes = [32, 8], strides = [1, 1]} : vector<32x32xf32> to vector<32x8xf32>
    %cst_38 = arith.constant dense<0.000000e+00> : vector<32x32xf32>
    %92 = tpu.matmul %89, %90, %cst_38 {dimension_numbers = #tpu.dot_dimension_numbers<[1], [1], [0], [0], [0, 0, 1, 0], [], []>} : vector<32x8xf32>, vector<32x8xf32>, vector<32x32xf32> -> vector<32x32xf32>
    %cst_39 = arith.constant 0.353553385 : f32
    %93 = vector.broadcast %cst_39 : f32 to vector<32x32xf32>
    %94 = arith.mulf %92, %93 : vector<32x32xf32>
    %95 = arith.addf %94, %70 : vector<32x32xf32>
    %cst_40 = arith.constant dense<0xFF800000> : vector<32xf32>
    %96 = vector.multi_reduction <maximumf>, %95, %cst_40 [1] : vector<32x32xf32> to vector<32xf32>
    %97 = vector.shape_cast %96 : vector<32xf32> to vector<32x1xf32>
    %98 = vector.broadcast %97 : vector<32x1xf32> to vector<32x32xf32>
    %99 = arith.subf %95, %98 : vector<32x32xf32>
    %100 = math.exp %99 : vector<32x32xf32>
    %cst_41 = arith.constant dense<0.000000e+00> : vector<32xf32>
    %101 = vector.multi_reduction <add>, %100, %cst_41 [1] : vector<32x32xf32> to vector<32xf32>
    %102 = vector.shape_cast %101 : vector<32xf32> to vector<32x1xf32>
    %103 = tpu.reciprocal %102 {approx = true} : vector<32x1xf32> -> vector<32x1xf32>
    %104 = vector.broadcast %103 : vector<32x1xf32> to vector<32x32xf32>
    %105 = arith.mulf %100, %104 : vector<32x32xf32>
    %cst_42 = arith.constant dense<0.000000e+00> : vector<32x8xf32>
    %106 = tpu.matmul %105, %91, %cst_42 {dimension_numbers = #tpu.dot_dimension_numbers<[1], [0], [0], [1], [0, 0, 1, 1], [], []>} : vector<32x32xf32>, vector<32x8xf32>, vector<32x8xf32> -> vector<32x8xf32>
    %107 = vector.extract_strided_slice %55 {offsets = [0, 16], sizes = [32, 8], strides = [1, 1]} : vector<32x32xf32> to vector<32x8xf32>
    %108 = vector.extract_strided_slice %56 {offsets = [0, 16], sizes = [32, 8], strides = [1, 1]} : vector<32x32xf32> to vector<32x8xf32>
    %109 = vector.extract_strided_slice %57 {offsets = [0, 16], sizes = [32, 8], strides = [1, 1]} : vector<32x32xf32> to vector<32x8xf32>
    %cst_43 = arith.constant dense<0.000000e+00> : vector<32x32xf32>
    %110 = tpu.matmul %107, %108, %cst_43 {dimension_numbers = #tpu.dot_dimension_numbers<[1], [1], [0], [0], [0, 0, 1, 0], [], []>} : vector<32x8xf32>, vector<32x8xf32>, vector<32x32xf32> -> vector<32x32xf32>
    %cst_44 = arith.constant 0.353553385 : f32
    %111 = vector.broadcast %cst_44 : f32 to vector<32x32xf32>
    %112 = arith.mulf %110, %111 : vector<32x32xf32>
    %113 = arith.addf %112, %70 : vector<32x32xf32>
    %cst_45 = arith.constant dense<0xFF800000> : vector<32xf32>
    %114 = vector.multi_reduction <maximumf>, %113, %cst_45 [1] : vector<32x32xf32> to vector<32xf32>
    %115 = vector.shape_cast %114 : vector<32xf32> to vector<32x1xf32>
    %116 = vector.broadcast %115 : vector<32x1xf32> to vector<32x32xf32>
    %117 = arith.subf %113, %116 : vector<32x32xf32>
    %118 = math.exp %117 : vector<32x32xf32>
    %cst_46 = arith.constant dense<0.000000e+00> : vector<32xf32>
    %119 = vector.multi_reduction <add>, %118, %cst_46 [1] : vector<32x32xf32> to vector<32xf32>
    %120 = vector.shape_cast %119 : vector<32xf32> to vector<32x1xf32>
    %121 = tpu.reciprocal %120 {approx = true} : vector<32x1xf32> -> vector<32x1xf32>
    %122 = vector.broadcast %121 : vector<32x1xf32> to vector<32x32xf32>
    %123 = arith.mulf %118, %122 : vector<32x32xf32>
    %cst_47 = arith.constant dense<0.000000e+00> : vector<32x8xf32>
    %124 = tpu.matmul %123, %109, %cst_47 {dimension_numbers = #tpu.dot_dimension_numbers<[1], [0], [0], [1], [0, 0, 1, 1], [], []>} : vector<32x32xf32>, vector<32x8xf32>, vector<32x8xf32> -> vector<32x8xf32>
    %125 = vector.extract_strided_slice %55 {offsets = [0, 24], sizes = [32, 8], strides = [1, 1]} : vector<32x32xf32> to vector<32x8xf32>
    %126 = vector.extract_strided_slice %56 {offsets = [0, 24], sizes = [32, 8], strides = [1, 1]} : vector<32x32xf32> to vector<32x8xf32>
    %127 = vector.extract_strided_slice %57 {offsets = [0, 24], sizes = [32, 8], strides = [1, 1]} : vector<32x32xf32> to vector<32x8xf32>
    %cst_48 = arith.constant dense<0.000000e+00> : vector<32x32xf32>
    %128 = tpu.matmul %125, %126, %cst_48 {dimension_numbers = #tpu.dot_dimension_numbers<[1], [1], [0], [0], [0, 0, 1, 0], [], []>} : vector<32x8xf32>, vector<32x8xf32>, vector<32x32xf32> -> vector<32x32xf32>
    %cst_49 = arith.constant 0.353553385 : f32
    %129 = vector.broadcast %cst_49 : f32 to vector<32x32xf32>
    %130 = arith.mulf %128, %129 : vector<32x32xf32>
    %131 = arith.addf %130, %70 : vector<32x32xf32>
    %cst_50 = arith.constant dense<0xFF800000> : vector<32xf32>
    %132 = vector.multi_reduction <maximumf>, %131, %cst_50 [1] : vector<32x32xf32> to vector<32xf32>
    %133 = vector.shape_cast %132 : vector<32xf32> to vector<32x1xf32>
    %134 = vector.broadcast %133 : vector<32x1xf32> to vector<32x32xf32>
    %135 = arith.subf %131, %134 : vector<32x32xf32>
    %136 = math.exp %135 : vector<32x32xf32>
    %cst_51 = arith.constant dense<0.000000e+00> : vector<32xf32>
    %137 = vector.multi_reduction <add>, %136, %cst_51 [1] : vector<32x32xf32> to vector<32xf32>
    %138 = vector.shape_cast %137 : vector<32xf32> to vector<32x1xf32>
    %139 = tpu.reciprocal %138 {approx = true} : vector<32x1xf32> -> vector<32x1xf32>
    %140 = vector.broadcast %139 : vector<32x1xf32> to vector<32x32xf32>
    %141 = arith.mulf %136, %140 : vector<32x32xf32>
    %cst_52 = arith.constant dense<0.000000e+00> : vector<32x8xf32>
    %142 = tpu.matmul %141, %127, %cst_52 {dimension_numbers = #tpu.dot_dimension_numbers<[1], [0], [0], [1], [0, 0, 1, 1], [], []>} : vector<32x32xf32>, vector<32x8xf32>, vector<32x8xf32> -> vector<32x8xf32>
    %143 = tpu.concatenate %88, %106, %124, %142 in 1 : vector<32x8xf32>, vector<32x8xf32>, vector<32x8xf32>, vector<32x8xf32> -> vector<32x32xf32>
    %144 = arith.truncf %143 : vector<32x32xf32> to vector<32x32xbf16>
    %c0_53 = arith.constant 0 : index
    %c0_54 = arith.constant 0 : index
    %145 = vector.load %arg13[%c0_53, %c0_54] : memref<32x32xbf16, #tpu.memory_space<vmem>>, vector<32x32xbf16>
    %cst_55 = arith.constant dense<0.000000e+00> : vector<32x32xf32>
    %146 = tpu.matmul %144, %145, %cst_55 {dimension_numbers = #tpu.dot_dimension_numbers<[1], [0], [0], [1], [0, 0, 1, 1], [], []>} : vector<32x32xbf16>, vector<32x32xbf16>, vector<32x32xf32> -> vector<32x32xf32>
    %c0_56 = arith.constant 0 : index
    %c0_57 = arith.constant 0 : index
    %147 = vector.load %arg14[%c0_56, %c0_57] : memref<1x32xf32, #tpu.memory_space<vmem>>, vector<1x32xf32>
    %148 = vector.broadcast %147 : vector<1x32xf32> to vector<32x32xf32>
    %149 = arith.addf %146, %148 : vector<32x32xf32>
    %150 = arith.addf %48, %149 : vector<32x32xf32>
    %c0_58 = arith.constant 0 : index
    %c0_59 = arith.constant 0 : index
    %151 = vector.load %arg15[%c0_58, %c0_59] : memref<1x32xf32, #tpu.memory_space<vmem>>, vector<1x32xf32>
    %c0_60 = arith.constant 0 : index
    %c0_61 = arith.constant 0 : index
    %152 = vector.load %arg16[%c0_60, %c0_61] : memref<1x32xf32, #tpu.memory_space<vmem>>, vector<1x32xf32>
    %cst_62 = arith.constant dense<0.000000e+00> : vector<32xf32>
    %153 = vector.multi_reduction <add>, %150, %cst_62 [1] : vector<32x32xf32> to vector<32xf32>
    %154 = vector.shape_cast %153 : vector<32xf32> to vector<32x1xf32>
    %cst_63 = arith.constant 3.200000e+01 : f32
    %155 = vector.broadcast %cst_63 : f32 to vector<32x1xf32>
    %156 = arith.divf %154, %155 : vector<32x1xf32>
    %157 = vector.broadcast %156 : vector<32x1xf32> to vector<32x32xf32>
    %158 = arith.subf %150, %157 : vector<32x32xf32>
    %159 = arith.mulf %158, %158 : vector<32x32xf32>
    %cst_64 = arith.constant dense<0.000000e+00> : vector<32xf32>
    %160 = vector.multi_reduction <add>, %159, %cst_64 [1] : vector<32x32xf32> to vector<32xf32>
    %161 = vector.shape_cast %160 : vector<32xf32> to vector<32x1xf32>
    %cst_65 = arith.constant 3.200000e+01 : f32
    %162 = vector.broadcast %cst_65 : f32 to vector<32x1xf32>
    %163 = arith.divf %161, %162 : vector<32x1xf32>
    %164 = vector.broadcast %156 : vector<32x1xf32> to vector<32x32xf32>
    %165 = arith.subf %150, %164 : vector<32x32xf32>
    %cst_66 = arith.constant 9.99999996E-13 : f32
    %166 = vector.broadcast %cst_66 : f32 to vector<32x1xf32>
    %167 = arith.addf %163, %166 : vector<32x1xf32>
    %168 = math.rsqrt %167 : vector<32x1xf32>
    %169 = vector.broadcast %168 : vector<32x1xf32> to vector<32x32xf32>
    %170 = arith.mulf %165, %169 : vector<32x32xf32>
    %171 = vector.broadcast %151 : vector<1x32xf32> to vector<32x32xf32>
    %172 = arith.mulf %170, %171 : vector<32x32xf32>
    %173 = vector.broadcast %152 : vector<1x32xf32> to vector<32x32xf32>
    %174 = arith.addf %172, %173 : vector<32x32xf32>
    %175 = arith.truncf %174 : vector<32x32xf32> to vector<32x32xbf16>
    %c0_67 = arith.constant 0 : index
    %c0_68 = arith.constant 0 : index
    %176 = vector.load %arg17[%c0_67, %c0_68] : memref<32x64xbf16, #tpu.memory_space<vmem>>, vector<32x64xbf16>
    %cst_69 = arith.constant dense<0.000000e+00> : vector<32x64xf32>
    %177 = tpu.matmul %175, %176, %cst_69 {dimension_numbers = #tpu.dot_dimension_numbers<[1], [0], [0], [1], [0, 0, 1, 1], [], []>} : vector<32x32xbf16>, vector<32x64xbf16>, vector<32x64xf32> -> vector<32x64xf32>
    %c0_70 = arith.constant 0 : index
    %c0_71 = arith.constant 0 : index
    %178 = vector.load %arg18[%c0_70, %c0_71] : memref<1x64xf32, #tpu.memory_space<vmem>>, vector<1x64xf32>
    %179 = vector.broadcast %178 : vector<1x64xf32> to vector<32x64xf32>
    %180 = arith.addf %177, %179 : vector<32x64xf32>
    %181 = arith.mulf %180, %180 : vector<32x64xf32>
    %182 = arith.mulf %180, %181 : vector<32x64xf32>
    %cst_72 = arith.constant 4.471500e-02 : f32
    %183 = vector.broadcast %cst_72 : f32 to vector<32x64xf32>
    %184 = arith.mulf %183, %182 : vector<32x64xf32>
    %185 = arith.addf %180, %184 : vector<32x64xf32>
    %cst_73 = arith.constant 0.797884583 : f32
    %186 = vector.broadcast %cst_73 : f32 to vector<32x64xf32>
    %187 = arith.mulf %186, %185 : vector<32x64xf32>
    %188 = math.tanh %187 : vector<32x64xf32>
    %cst_74 = arith.constant 1.000000e+00 : f32
    %189 = vector.broadcast %cst_74 : f32 to vector<32x64xf32>
    %190 = arith.addf %189, %188 : vector<32x64xf32>
    %cst_75 = arith.constant 5.000000e-01 : f32
    %191 = vector.broadcast %cst_75 : f32 to vector<32x64xf32>
    %192 = arith.mulf %191, %190 : vector<32x64xf32>
    %193 = arith.mulf %180, %192 : vector<32x64xf32>
    %194 = arith.truncf %193 : vector<32x64xf32> to vector<32x64xbf16>
    %c0_76 = arith.constant 0 : index
    %c0_77 = arith.constant 0 : index
    %195 = vector.load %arg19[%c0_76, %c0_77] : memref<64x32xbf16, #tpu.memory_space<vmem>>, vector<64x32xbf16>
    %cst_78 = arith.constant dense<0.000000e+00> : vector<32x32xf32>
    %196 = tpu.matmul %194, %195, %cst_78 {dimension_numbers = #tpu.dot_dimension_numbers<[1], [0], [0], [1], [0, 0, 1, 1], [], []>} : vector<32x64xbf16>, vector<64x32xbf16>, vector<32x32xf32> -> vector<32x32xf32>
    %c0_79 = arith.constant 0 : index
    %c0_80 = arith.constant 0 : index
    %197 = vector.load %arg20[%c0_79, %c0_80] : memref<1x32xf32, #tpu.memory_space<vmem>>, vector<1x32xf32>
    %198 = vector.broadcast %197 : vector<1x32xf32> to vector<32x32xf32>
    %199 = arith.addf %196, %198 : vector<32x32xf32>
    %200 = arith.addf %174, %199 : vector<32x32xf32>
    %c0_81 = arith.constant 0 : index
    %c0_82 = arith.constant 0 : index
    %201 = vector.load %arg21[%c0_81, %c0_82] : memref<1x32xf32, #tpu.memory_space<vmem>>, vector<1x32xf32>
    %c0_83 = arith.constant 0 : index
    %c0_84 = arith.constant 0 : index
    %202 = vector.load %arg22[%c0_83, %c0_84] : memref<1x32xf32, #tpu.memory_space<vmem>>, vector<1x32xf32>
    %cst_85 = arith.constant dense<0.000000e+00> : vector<32xf32>
    %203 = vector.multi_reduction <add>, %200, %cst_85 [1] : vector<32x32xf32> to vector<32xf32>
    %204 = vector.shape_cast %203 : vector<32xf32> to vector<32x1xf32>
    %cst_86 = arith.constant 3.200000e+01 : f32
    %205 = vector.broadcast %cst_86 : f32 to vector<32x1xf32>
    %206 = arith.divf %204, %205 : vector<32x1xf32>
    %207 = vector.broadcast %206 : vector<32x1xf32> to vector<32x32xf32>
    %208 = arith.subf %200, %207 : vector<32x32xf32>
    %209 = arith.mulf %208, %208 : vector<32x32xf32>
    %cst_87 = arith.constant dense<0.000000e+00> : vector<32xf32>
    %210 = vector.multi_reduction <add>, %209, %cst_87 [1] : vector<32x32xf32> to vector<32xf32>
    %211 = vector.shape_cast %210 : vector<32xf32> to vector<32x1xf32>
    %cst_88 = arith.constant 3.200000e+01 : f32
    %212 = vector.broadcast %cst_88 : f32 to vector<32x1xf32>
    %213 = arith.divf %211, %212 : vector<32x1xf32>
    %214 = vector.broadcast %206 : vector<32x1xf32> to vector<32x32xf32>
    %215 = arith.subf %200, %214 : vector<32x32xf32>
    %cst_89 = arith.constant 9.99999996E-13 : f32
    %216 = vector.broadcast %cst_89 : f32 to vector<32x1xf32>
    %217 = arith.addf %213, %216 : vector<32x1xf32>
    %218 = math.rsqrt %217 : vector<32x1xf32>
    %219 = vector.broadcast %218 : vector<32x1xf32> to vector<32x32xf32>
    %220 = arith.mulf %215, %219 : vector<32x32xf32>
    %221 = vector.broadcast %201 : vector<1x32xf32> to vector<32x32xf32>
    %222 = arith.mulf %220, %221 : vector<32x32xf32>
    %223 = vector.broadcast %202 : vector<1x32xf32> to vector<32x32xf32>
    %224 = arith.addf %222, %223 : vector<32x32xf32>
    %c0_90 = arith.constant 0 : index
    %c0_91 = arith.constant 0 : index
    %225 = vector.load %arg5[%c0_90, %c0_91] : memref<1x32xi32, #tpu.memory_space<vmem>>, vector<1x32xi32>
    %226 = tpu.iota {dimensions = array<i32: 0>} : vector<16x32xi32>
    %227 = vector.broadcast %225 : vector<1x32xi32> to vector<16x32xi32>
    %228 = arith.cmpi eq, %226, %227 : vector<16x32xi32>
    %229 = arith.extui %228 : vector<16x32xi1> to vector<16x32xi32>
    %230 = arith.sitofp %229 : vector<16x32xi32> to vector<16x32xf32>
    %cst_92 = arith.constant dense<0.000000e+00> : vector<16xf32>
    %231 = vector.multi_reduction <add>, %230, %cst_92 [1] : vector<16x32xf32> to vector<16xf32>
    %232 = vector.shape_cast %231 : vector<16xf32> to vector<16x1xf32>
    %cst_93 = arith.constant dense<0.000000e+00> : vector<16x32xf32>
    %233 = tpu.matmul %230, %224, %cst_93 {dimension_numbers = #tpu.dot_dimension_numbers<[1], [0], [0], [1], [0, 0, 1, 1], [], []>} : vector<16x32xf32>, vector<32x32xf32>, vector<16x32xf32> -> vector<16x32xf32>
    %cst_94 = arith.constant 1.000000e+00 : f32
    %234 = vector.broadcast %cst_94 : f32 to vector<16x1xf32>
    %235 = arith.maximumf %232, %234 : vector<16x1xf32>
    %236 = vector.broadcast %235 : vector<16x1xf32> to vector<16x32xf32>
    %237 = arith.divf %233, %236 : vector<16x32xf32>
    %c0_95 = arith.constant 0 : index
    %c0_96 = arith.constant 0 : index
    %238 = vector.load %arg23[%c0_95, %c0_96] : memref<16x32xf32, #tpu.memory_space<vmem>>, vector<16x32xf32>
    tpu.vector_store %arg23[%c0_95, %c0_96], %237 {strides = array<i32>} : memref<16x32xf32, #tpu.memory_space<vmem>>, vector<16x32xf32>,
    return
  }
}

</mosaic_0001>

<bundles_post_ra>
// kernel: pref_encoder_forward.1
= control target key start
LH: loop header
LB: loop body
LE: loop exit
PB: predicated region body
PF: predicated region fallthrough
CT: control target
= control target key end

     0   :  { %s2765_s0 = inlined_call_operand.vmem [shape: s32[32,1], index: 0, kind: input, shape index: {}]   ;;  %s2766_s1 = inlined_call_operand.vmem [shape: s32[32,1], index: 1, kind: input, shape index: {}]   ;;  %s2767_s2 = inlined_call_operand.vmem [shape: f32[1,32], index: 2, kind: input, shape index: {}]   ;;  %s2768_s3 = inlined_call_operand.vmem [shape: s32[32,1], index: 3, kind: input, shape index: {}]   ;;  %s2769_s4 = inlined_call_operand.vmem [shape: s32[1,32], index: 4, kind: input, shape index: {}]   ;;  %s2770_s5 = inlined_call_operand.vmem [shape: s32[1,32], index: 5, kind: input, shape index: {}]   ;;  %s2771_s6 = inlined_call_operand.vmem [shape: bf16[64,32], index: 6, kind: input, shape index: {}]   ;;  %s2772_s7 = inlined_call_operand.vmem [shape: f32[16,32], index: 7, kind: input, shape index: {}]   ;;  %s2773_s8 = inlined_call_operand.vmem [shape: f32[2,32], index: 8, kind: input, shape index: {}]   ;;  %s2774_s9 = inlined_call_operand.vmem [shape: f32[1,32], index: 9, kind: input, shape index: {}]   ;;  %s2775_s10 = inlined_call_operand.vmem [shape: f32[1,32], index: 10, kind: input, shape index: {}]   ;;  %s2776_s11 = inlined_call_operand.vmem [shape: bf16[32,96], index: 11, kind: input, shape index: {}]   ;;  %s2777_s12 = inlined_call_operand.vmem [shape: f32[1,96], index: 12, kind: input, shape index: {}]   ;;  %s2778_s13 = inlined_call_operand.vmem [shape: bf16[32,32], index: 13, kind: input, shape index: {}]   ;;  %s2779_s14 = inlined_call_operand.vmem [shape: f32[1,32], index: 14, kind: input, shape index: {}]   ;;  %s2780_s15 = inlined_call_operand.vmem [shape: f32[1,32], index: 15, kind: input, shape index: {}]   ;;  %s2781_s16 = inlined_call_operand.vmem [shape: f32[1,32], index: 16, kind: input, shape index: {}]   ;;  %s2782_s17 = inlined_call_operand.vmem [shape: bf16[32,64], index: 17, kind: input, shape index: {}]   ;;  %s2783_s18 = inlined_call_operand.vmem [shape: f32[1,64], index: 18, kind: input, shape index: {}]   ;;  %s2784_s19 = inlined_call_operand.vmem [shape: bf16[64,32], index: 19, kind: input, shape index: {}]   ;;  %s2785_s20 = inlined_call_operand.vmem [shape: f32[1,32], index: 20, kind: input, shape index: {}]   ;;  %s2786_s21 = inlined_call_operand.vmem [shape: f32[1,32], index: 21, kind: input, shape index: {}]   ;;  %s2787_s22 = inlined_call_operand.vmem [shape: f32[1,32], index: 22, kind: input, shape index: {}]   ;;  %s2788_s23 = inlined_call_operand.hbm [shape: f32[16,32], index: 23, kind: output, shape index: {}]  }
   0x1   :  { %2794 = sst [smem:[#allocation5_spill]] %s2765_s0 }
   0x2   :  { %2795 = sst [smem:[#allocation6_spill]] %s2766_s1 }
   0x3   :  { %2796 = sst [smem:[#allocation7_spill]] %s2767_s2 }
   0x4   :  { %2797 = sst [smem:[#allocation8_spill]] %s2768_s3 }
   0x5   :  { %2798 = sst [smem:[#allocation9_spill]] %s2769_s4 }
   0x6   :  { %2799 = sst [smem:[#allocation10_spill]] %s2770_s5 }
   0x7   :  { %2800 = sst [smem:[#allocation11_spill]] %s2771_s6 }
   0x8   :  { %2801 = sst [smem:[#allocation12_spill]] %s2772_s7 }
   0x9   :  { %s2802_s24 = sld [smem:[#allocation5_spill]]  ;;  %v2005_v2 = vmov 0  }
   0xa   :  { %1791 = vset.pattern.permute.xlu1 %v2005_v2  ;;  %1790 = vset.pattern.permute.xlu0 %v2005_v2  ;;  %s2803_s2 = sld [smem:[#allocation11_spill]] }
   0xb   :  { %1792 = vset.pattern.permute.xlu2 %v2005_v2 }
   0xf   :  { %v78_v0 = vld [vmem:[%s2802_s24 + $0x10] sm:$0xff]  ;;  %v76_v1 = vld [vmem:[%s2802_s24] sm:$0xff]  ;;  %v79_v4 = vld [vmem:[%s2802_s24 + $0x18] sm:$0xff] }
  0x10   :  { %89 = vperm.xlu1 %1791, %v78_v0   ;;  %83 = vperm.xlu0 %1790, %v76_v1   ;;  %v1757_v3 = vld [vmem:[%s2803_s2 + $0x18] sm:$0xff]  ;;  %v77_v5 = vld [vmem:[%s2802_s24 + $0x8] sm:$0xff] }
  0x11   :  { %189 = vmatpush.bf16.msra.mxu0 %v1757_v3 }
  0x12   :  { %28 = vsyncpa [#allocation3], 0  ;;  %s2804_s0 = sld [smem:[#allocation6_spill]]  ;;  %v1756_v10 = vld [vmem:[%s2803_s2 + $0x10] sm:$0xff]  ;;  %v1755_v11 = vld [vmem:[%s2803_s2 + $0x8] sm:$0xff]  ;;  %v80_v14 = vlaneseq  ;;  %v2006_v22 = vmov 0.0  }
  0x13   :  { %v1754_v12 = vld [vmem:[%s2803_s2] sm:$0xff]  ;;  %vm178_vm6 = vcmask 523264   ;;  %s2805_s25 = sld [smem:[#allocation12_spill]]  ;;  %vm210_vm10 = vcmask 261120   ;;  %v2007_v58 = vmov 32.0   ;;  %s2008_s2 = smov 96  }
  0x14   :  { %v81_v18 = vand.u32 127, %v80_v14  ;;  %v1863_v31 = vld [vmem:[%s2773_s8] ss:$0 sm:$0xff]  ;;  %v1864_v32 = vld [vmem:[%s2773_s8 + $0x1] ss:$0 sm:$0xff]  ;;  %1877 = vrcp.f32 %v2007_v58  ;;  %s2010_s3 = smov 120  }
  0x15   :  { %190 = vmatpush.bf16.msra.mxu0 %v1756_v10  ;;  %s2012_s4 = smov 72   ;;  %s2013_s30 = smov 112  }
  0x16   :  { %s2014_s24 = smov 104   ;;  %s2806_s5 = sld [smem:[#allocation8_spill]] }
  0x17   :  { %s2015_s28 = smov 64   ;;  %s2022_s8 = smov 16  }
  0x18   :  { %v117_v6 = vld [vmem:[%s2804_s0 + $0x8] sm:$0xff]  ;;  %v116_v7 = vld [vmem:[%s2804_s0] sm:$0xff]  ;;  %92 = vperm.xlu1 %1791, %v79_v4   ;;  %86 = vperm.xlu0 %1790, %v77_v5   ;;  %v118_v13 = vld [vmem:[%s2804_s0 + $0x10] sm:$0xff]  ;;  %s2811_s1 = sld [smem:[#allocation10_spill]]  ;;  %s1620_s7 = sshll.u32 %s2788_s23, 4  ;;  %s1621_s7 = int_to_ptr.hbm [resolvable:$true] %s1620_s7 }
  0x19   :  { %vm121_vm0 = vcmp.eq.s32.totalorder %v117_v6, 0  ;;  %vm120_vm1 = vcmp.eq.s32.totalorder %v116_v7, 0  ;;  %191 = vmatpush.bf16.msra.mxu0 %v1755_v11  ;;  %vm122_vm2 = vcmp.eq.s32.totalorder %v118_v13, 0  ;;  %v119_v16 = vld [vmem:[%s2804_s0 + $0x18] sm:$0xff]  ;;  %v152_v33 = vld [vmem:[%s2805_s25] sm:$0xff]  ;;  %v153_v45 = vld [vmem:[%s2805_s25 + $0x8] sm:$0xff] }
  0x1a   :  { %v127_v8 = vsel %vm121_vm0, 1, %v2005_v2  ;;  %v126_v9 = vsel %vm120_vm1, 1, %v2005_v2  ;;  %v128_v15 = vsel %vm122_vm2, 1, %v2005_v2  ;;  %vm123_vm3 = vcmp.eq.s32.totalorder %v119_v16, 0  ;;  %v1878_v59 = vpop.eup %1877  ;;  %s2011_s0 = smov 80   ;;  %s2021_s25 = smov 24  }
  0x1b   :  { %137 = vperm.xlu2 %1792, %v128_v15   ;;  %v129_v19 = vsel %vm123_vm3, 1, %v2005_v2  ;;  %v224_v60 = vmul.f32 32.0, %v1878_v59  ;;  %vm228_vm14 = vweird.f32 %v1878_v59 }
  0x1d   :  { %192 = vmatpush.bf16.msra.mxu0 %v1754_v12  ;;  %v225_v61 = vsub.f32 1.0, %v224_v60 }
  0x1f   :  { %v226_v62 = vmul.f32 %v1878_v59, %v225_v61 }
  0x20   :  { %134 = vperm.xlu1 %1791, %v127_v8   ;;  %131 = vperm.xlu0 %1790, %v126_v9  }
  0x21   :  { %v227_v63 = vadd.f32 %v1878_v59, %v226_v62 }
  0x23   :  { %140 = vperm.xlu2 %1792, %v129_v19   ;;  %v2211_v0 = vsel %vm228_vm14, %v1878_v59, %v227_v63  ;;  %v1865_v63 = vld [vmem:[%s2774_s9] ss:$0 sm:$0xff] }
  0x75   :  { %v138_v40 = vpop.permute.xlu2 %137 }
  0x76   :  { %vm144_vm11 = vcmp.eq.s32.totalorder %v138_v40, 1 }
  0x77   :  { %v150_v41 = vsel %vm144_vm11, %v1863_v31, %v1864_v32 }
  0x7d   :  { %v141_v47 = vpop.permute.xlu2 %140 }
  0x7e   :  { %vm145_vm13 = vcmp.eq.s32.totalorder %v141_v47, 1 }
  0x7f   :  { %v151_v54 = vsel %vm145_vm13, %v1863_v31, %v1864_v32  ;;  %vm414_vm13 = vcmask 64512  }
  0x82   :  { %v84_v17 = vpop.permute.xlu0 %83  ;;  %v90_v21 = vpop.permute.xlu1 %89 }
  0x83   :  { %vm94_vm4 = vcmp.eq.s32.totalorder %v81_v18, %v84_v17  ;;  %vm96_vm7 = vcmp.eq.s32.totalorder %v81_v18, %v90_v21 }
  0x84   :  { %v1632_v23 = vsel %vm94_vm4, 1.0, %v2006_v22  ;;  %v1634_v27 = vsel %vm96_vm7, 1.0, %v2006_v22 }
  0x8a   :  { %v87_v20 = vpop.permute.xlu0 %86  ;;  %v93_v26 = vpop.permute.xlu1 %92 }
  0x8b   :  { %vm95_vm5 = vcmp.eq.s32.totalorder %v81_v18, %v87_v20  ;;  %vm97_vm8 = vcmp.eq.s32.totalorder %v81_v18, %v93_v26 }
  0x8c   :  { %v1633_v24 = vsel %vm95_vm5, 1.0, %v2006_v22  ;;  %v1635_v28 = vsel %vm97_vm8, 1.0, %v2006_v22 }
  0x8d   :  { %v106_v25 = vpack.c.bf16 %v1633_v24, %v1632_v23  ;;  %v107_v29 = vpack.c.bf16 %v1635_v28, %v1634_v27  ;;  %v1759_v27 = vld [vmem:[%s2776_s11 + $0x8] sm:$0xff] }
  0x8e   :  { %354 = vmatpush.bf16.msra.mxu1 %v1759_v27  ;;  %1768 = vmatpush.bf16.msra.mxu2 %v1759_v27 }
  0x8f   :  { %1652 = vmatmul.msk.bf16.vlgmr.msra.gmra.mxu0 %vm178_vm6, %v106_v25 }
  0x92   :  { %v132_v30 = vpop.permute.xlu0 %131  ;;  %v135_v44 = vpop.permute.xlu1 %134 }
  0x93   :  { %vm142_vm9 = vcmp.eq.s32.totalorder %v132_v30, 1  ;;  %vm143_vm12 = vcmp.eq.s32.totalorder %v135_v44, 1 }
  0x94   :  { %v148_v36 = vsel %vm142_vm9, %v1863_v31, %v1864_v32  ;;  %v149_v50 = vsel %vm143_vm12, %v1863_v31, %v1864_v32  ;;  %v1758_v31 = vld [vmem:[%s2776_s11] sm:$0xff] }
  0x95   :  { %355 = vmatpush.bf16.msra.mxu1 %v1758_v31  ;;  %1769 = vmatpush.bf16.msra.mxu2 %v1758_v31  ;;  %v367_v31 = vld [vmem:[%s2806_s5] sm:$0xff] }
  0x9f   :  { %1653 = vmatmul.msk.bf16.gmra.mxu0 %vm178_vm6, %v107_v29 }
 0x10c   :  { %v194_v34 = vpop.f32.mrf.mxu0 }
 0x10d   :  { %v195_v35 = vadd.f32 %v194_v34, %v152_v33 }
 0x10f   :  { %v204_v37 = vadd.f32 %v195_v35, %v148_v36 }
 0x111   :  { %v211_v38 = vsel %vm210_vm10, %v204_v37, 0.0 }
 0x112   :  { %212 = vadd.xlane.f32.xlu1 %v211_v38 }
 0x114   :  { %v196_v39 = vpop.f32.mrf.mxu0 }
 0x115   :  { %v197_v48 = vadd.f32 %v196_v39, %v153_v45 }
 0x117   :  { %v205_v53 = vadd.f32 %v197_v48, %v149_v50 }
 0x119   :  { %v214_v57 = vsel %vm210_vm10, %v205_v53, 0.0 }
 0x11c   :  { %v199_v42 = vpop.f32.mrf.mxu0 }
 0x11d   :  { %v200_v43 = vadd.f32 %v199_v42, %v152_v33 }
 0x11f   :  { %v206_v46 = vadd.f32 %v200_v43, %v150_v41 }
 0x121   :  { %v217_v49 = vsel %vm210_vm10, %v206_v46, 0.0 }
 0x122   :  { %218 = vadd.xlane.f32.xlu2 %v217_v49 }
 0x124   :  { %v201_v51 = vpop.f32.mrf.mxu0 }
 0x125   :  { %v202_v52 = vadd.f32 %v201_v51, %v153_v45 }
 0x127   :  { %v207_v55 = vadd.f32 %v202_v52, %v151_v54 }
 0x129   :  { %v220_v56 = vsel %vm210_vm10, %v207_v55, 0.0 }
 0x12a   :  { %221 = vadd.xlane.f32.xlu0 %v220_v56  ;;  %215 = vadd.xlane.f32.xlu2 %v214_v57 }
 0x185   :  { %v213_v1 = vpop.xlane.xlu1 %212 }
 0x186   :  { %v230_v3 = vmul.f32 %v2211_v0, %v213_v1 }
 0x188   :  { %v2214_v4 = vsub.f32 %v204_v37, %v230_v3 }
 0x18a   :  { %v238_v5 = vmul.f32 %v2214_v4, %v2214_v4 }
 0x18c   :  { %v242_v6 = vsel %vm210_vm10, %v238_v5, 0.0 }
 0x18d   :  { %243 = vadd.xlane.f32.xlu1 %v242_v6 }
 0x195   :  { %v219_v7 = vpop.xlane.xlu2 %218 }
 0x196   :  { %v232_v8 = vmul.f32 %v2211_v0, %v219_v7 }
 0x198   :  { %v2220_v9 = vsub.f32 %v206_v46, %v232_v8 }
 0x19a   :  { %v240_v10 = vmul.f32 %v2220_v9, %v2220_v9 }
 0x19c   :  { %v248_v11 = vsel %vm210_vm10, %v240_v10, 0.0 }
 0x19d   :  { %249 = vadd.xlane.f32.xlu2 %v248_v11  ;;  %v216_v12 = vpop.xlane.xlu2 %215  ;;  %v222_v13 = vpop.xlane.xlu0 %221 }
 0x19e   :  { %v231_v15 = vmul.f32 %v2211_v0, %v216_v12  ;;  %v233_v16 = vmul.f32 %v2211_v0, %v222_v13 }
 0x1a0   :  { %v2227_v17 = vsub.f32 %v205_v53, %v231_v15  ;;  %v2229_v18 = vsub.f32 %v207_v55, %v233_v16 }
 0x1a2   :  { %v239_v19 = vmul.f32 %v2227_v17, %v2227_v17  ;;  %v241_v20 = vmul.f32 %v2229_v18, %v2229_v18 }
 0x1a4   :  { %v245_v21 = vsel %vm210_vm10, %v239_v19, 0.0  ;;  %v251_v23 = vsel %vm210_vm10, %v241_v20, 0.0 }
 0x1a5   :  { %246 = vadd.xlane.f32.xlu2 %v245_v21  ;;  %252 = vadd.xlane.f32.xlu0 %v251_v23 }
 0x200   :  { %v244_v24 = vpop.xlane.xlu1 %243 }
 0x201   :  { %v254_v25 = vmul.f32 %v244_v24, %v2211_v0 }
 0x203   :  { %v258_v26 = vadd.f32 1e-12, %v254_v25 }
 0x205   :  { %1879 = vrsqrt.f32 %v258_v26  ;;  %vm268_vm1 = vweird.f32 %v258_v26 }
 0x20b   :  { %v1880_v29 = vpop.eup %1879 }
 0x20c   :  { %v263_v33 = vmul.f32 %v1880_v29, %v258_v26  ;;  %vm269_vm15 = vweird.f32 %v1880_v29 }
 0x20d   :  { %vm270_vm2 = vmor %vm268_vm1, %vm269_vm15 }
 0x20e   :  { %v264_v34 = vmul.f32 %v1880_v29, %v263_v33  ;;  %v368_v33 = vld [vmem:[%s2806_s5 + $0x8] sm:$0xff] }
 0x210   :  { %v250_v28 = vpop.xlane.xlu2 %249  ;;  %v265_v42 = vmul.f32 0.5, %v264_v34  ;;  %v370_v34 = vld [vmem:[%s2806_s5 + $0x18] sm:$0xff] }
 0x211   :  { %v256_v30 = vmul.f32 %v250_v28, %v2211_v0 }
 0x212   :  { %v266_v45 = vsub.f32 1.5, %v265_v42 }
 0x213   :  { %v260_v32 = vadd.f32 1e-12, %v256_v30 }
 0x214   :  { %v267_v50 = vmul.f32 %v1880_v29, %v266_v45 }
 0x215   :  { %1881 = vrsqrt.f32 %v260_v32  ;;  %vm288_vm3 = vweird.f32 %v260_v32 }
 0x216   :  { %v271_v56 = vsel %vm270_vm2, %v1880_v29, %v267_v50 }
 0x217   :  { %v302_v61 = vmul.f32 %v271_v56, %v2214_v4  ;;  %v1866_v4 = vld [vmem:[%s2775_s10] ss:$0 sm:$0xff]  ;;  %s2807_s10 = sld [smem:[#allocation7_spill]] }
 0x218   :  { %v247_v35 = vpop.xlane.xlu2 %246  ;;  %v253_v36 = vpop.xlane.xlu0 %252 }
 0x219   :  { %v255_v37 = vmul.f32 %v247_v35, %v2211_v0  ;;  %v257_v38 = vmul.f32 %v253_v36, %v2211_v0  ;;  %v309_v10 = vmul.f32 %v1865_v63, %v302_v61 }
 0x21b   :  { %v1882_v39 = vpop.eup %1881  ;;  %v259_v40 = vadd.f32 1e-12, %v255_v37  ;;  %v261_v41 = vadd.f32 1e-12, %v257_v38  ;;  %v2257_v15 = vadd.f32 %v1866_v4, %v309_v10 }
 0x21c   :  { %v283_v43 = vmul.f32 %v1882_v39, %v260_v32  ;;  %vm289_vm0 = vweird.f32 %v1882_v39  ;;  %v369_v32 = vld [vmem:[%s2806_s5 + $0x10] sm:$0xff] }
 0x21d   :  { %1883 = vrsqrt.f32 %v259_v40  ;;  %vm290_vm4 = vmor %vm288_vm3, %vm289_vm0  ;;  %vm278_vm8 = vweird.f32 %v259_v40  ;;  %vm298_vm11 = vweird.f32 %v261_v41 }
 0x21e   :  { %v284_v44 = vmul.f32 %v1882_v39, %v283_v43  ;;  %1885 = vrsqrt.f32 %v261_v41 }
 0x220   :  { %v285_v46 = vmul.f32 0.5, %v284_v44 }
 0x222   :  { %v286_v47 = vsub.f32 1.5, %v285_v46 }
 0x223   :  { %v1884_v48 = vpop.eup %1883 }
 0x224   :  { %v1886_v49 = vpop.eup %1885  ;;  %v273_v51 = vmul.f32 %v1884_v48, %v259_v40  ;;  %v287_v52 = vmul.f32 %v1882_v39, %v286_v47  ;;  %vm279_vm5 = vweird.f32 %v1884_v48 }
 0x225   :  { %v293_v53 = vmul.f32 %v1886_v49, %v261_v41  ;;  %vm299_vm7 = vweird.f32 %v1886_v49  ;;  %vm280_vm9 = vmor %vm278_vm8, %vm279_vm5 }
 0x226   :  { %v274_v54 = vmul.f32 %v1884_v48, %v273_v51  ;;  %v291_v58 = vsel %vm290_vm4, %v1882_v39, %v287_v52  ;;  %vm300_vm12 = vmor %vm298_vm11, %vm299_vm7  ;;  %vm1120_vm11 = vcmask 195584  }
 0x227   :  { %v294_v55 = vmul.f32 %v1886_v49, %v293_v53  ;;  %v304_v1 = vmul.f32 %v291_v58, %v2220_v9 }
 0x228   :  { %v275_v57 = vmul.f32 0.5, %v274_v54 }
 0x229   :  { %v295_v59 = vmul.f32 0.5, %v294_v55  ;;  %v311_v12 = vmul.f32 %v1865_v63, %v304_v1 }
 0x22a   :  { %v276_v60 = vsub.f32 1.5, %v275_v57 }
 0x22b   :  { %v296_v62 = vsub.f32 1.5, %v295_v59  ;;  %v2261_v19 = vadd.f32 %v1866_v4, %v311_v12 }
 0x22c   :  { %v277_v3 = vmul.f32 %v1884_v48, %v276_v60 }
 0x22d   :  { %v297_v5 = vmul.f32 %v1886_v49, %v296_v62 }
 0x22e   :  { %v281_v6 = vsel %vm280_vm9, %v1884_v48, %v277_v3  ;;  %vm1115_vm9 = vcmask 130048  }
 0x22f   :  { %v303_v7 = vmul.f32 %v281_v6, %v2227_v17  ;;  %v301_v8 = vsel %vm300_vm12, %v1886_v49, %v297_v5 }
 0x230   :  { %v305_v11 = vmul.f32 %v301_v8, %v2229_v18  ;;  %v1867_v18 = vld [vmem:[%s2777_s12] ss:$0 sm:$0xff]  ;;  %s2009_s12 = smov 88  }
 0x231   :  { %v310_v13 = vmul.f32 %v1865_v63, %v303_v7 }
 0x232   :  { %v312_v9 = vmul.f32 %v1865_v63, %v305_v11  ;;  %v389_v63 = vld [vmem:[%s2807_s10] sm:$0x1] }
 0x233   :  { %v2259_v16 = vadd.f32 %v1866_v4, %v310_v13  ;;  %vm390_vm14 = vcmp.gt.f32.partialorder %v389_v63, 0.5 }
 0x234   :  { %v2263_v20 = vadd.f32 %v1866_v4, %v312_v9  ;;  %v391_v5 = vsel %vm390_vm14, 1, %v2005_v2  ;;  %v2016_v2 = vmov -1e+09  }
 0x235   :  { %v320_v17 = vpack.c.bf16 %v2259_v16, %v2257_v15  ;;  %v392_v6 = vperm.slane %v391_v5, 0 }
 0x236   :  { %v321_v21 = vpack.c.bf16 %v2263_v20, %v2261_v19 }
 0x237   :  { %1662 = vmatmul.msk.bf16.vlgmr.msra.gmra.mxu1 %vm210_vm10, %v320_v17  ;;  %vm2372_vm15 = vcmp.eq.s32.totalorder %v392_v6, 1 }
 0x238   :  { %1663 = vmatmul.msk.bf16.vlgmr.msra.gmra.mxu2 %vm210_vm10, %v321_v21 }
 0x2b4   :  { %v357_v23 = vpop.f32.mrf.mxu1 }
 0x2b5   :  { %v2274_v24 = vadd.f32 %v1867_v18, %v357_v23 }
 0x2b7   :  { %406 = vrot.lane.b32.xlu0 %v2274_v24, %s2008_s2 }
 0x2bb   :  { %v362_v25 = vpop.f32.mrf.mxu2 }
 0x2bc   :  { %v2277_v26 = vadd.f32 %v1867_v18, %v362_v25  ;;  %v359_v27 = vpop.f32.mrf.mxu1 }
 0x2bd   :  { %v2279_v28 = vadd.f32 %v1867_v18, %v359_v27 }
 0x2be   :  { %410 = vrot.lane.b32.xlu1 %v2277_v26, %s2008_s2 }
 0x2bf   :  { %408 = vrot.lane.b32.xlu2 %v2279_v28, %s2008_s2  ;;  %v2324_v35 = vpack.i.bf16 %v2274_v24, %v2279_v28 }
 0x2c3   :  { %v364_v29 = vpop.f32.mrf.mxu2 }
 0x2c4   :  { %v2283_v30 = vadd.f32 %v1867_v18, %v364_v29 }
 0x2c6   :  { %412 = vrot.lane.b32.xlu0 %v2283_v30, %s2008_s2  ;;  %579 = vrot.lane.b32.xlu1 %v2283_v30, %s2009_s12  ;;  %v2329_v36 = vpack.i.bf16 %v2277_v26, %v2283_v30 }
 0x2c7   :  { %575 = vrot.lane.b32.xlu2 %v2279_v28, %s2009_s12 }
 0x2ce   :  { %577 = vrot.lane.b32.xlu0 %v2277_v26, %s2009_s12  ;;  %573 = vrot.lane.b32.xlu1 %v2274_v24, %s2009_s12 }
 0x2cf   :  { %567 = vrot.lane.b32.xlu2 %v2279_v28, %s2010_s3 }
 0x2d6   :  { %565 = vrot.lane.b32.xlu0 %v2274_v24, %s2010_s3  ;;  %569 = vrot.lane.b32.xlu1 %v2277_v26, %s2010_s3 }
 0x2d7   :  { %739 = vrot.lane.b32.xlu2 %v2274_v24, %s2011_s0 }
 0x2de   :  { %909 = vrot.lane.b32.xlu0 %v2277_v26, %s2012_s4  ;;  %743 = vrot.lane.b32.xlu1 %v2277_v26, %s2011_s0 }
 0x2df   :  { %911 = vrot.lane.b32.xlu2 %v2283_v30, %s2012_s4 }
 0x2e6   :  { %907 = vrot.lane.b32.xlu0 %v2279_v28, %s2012_s4  ;;  %741 = vrot.lane.b32.xlu1 %v2279_v28, %s2011_s0 }
 0x2e7   :  { %571 = vrot.lane.b32.xlu2 %v2283_v30, %s2010_s3  ;;  %s2808_s3 = sld [smem:[#allocation9_spill]] }
 0x2ed   :  { %v1868_v7 = vld [vmem:[%s2808_s3] ss:$0 sm:$0xff] }
 0x2ee   :  { %731 = vrot.lane.b32.xlu0 %v2274_v24, %s2013_s30  ;;  %905 = vrot.lane.b32.xlu1 %v2274_v24, %s2012_s4  ;;  %s2018_s4 = smov 48  }
 0x2ef   :  { %897 = vrot.lane.b32.xlu2 %v2274_v24, %s2014_s24 }
 0x2f6   :  { %745 = vrot.lane.b32.xlu0 %v2283_v30, %s2011_s0  ;;  %733 = vrot.lane.b32.xlu1 %v2279_v28, %s2013_s30  ;;  %s2017_s0 = smov 56  }
 0x2f7   :  { %735 = vrot.lane.b32.xlu2 %v2277_v26, %s2013_s30 }
 0x2fe   :  { %899 = vrot.lane.b32.xlu0 %v2279_v28, %s2014_s24  ;;  %901 = vrot.lane.b32.xlu1 %v2277_v26, %s2014_s24 }
 0x2ff   :  { %903 = vrot.lane.b32.xlu2 %v2283_v30, %s2014_s24  ;;  %s2020_s24 = smov 8  }
 0x306   :  { %737 = vrot.lane.b32.xlu0 %v2283_v30, %s2013_s30  ;;  %373 = vperm.xlu1 %1791, %v367_v31   ;;  %s2019_s30 = smov 40  }
 0x307   :  { %379 = vperm.xlu2 %1792, %v369_v32  }
 0x30e   :  { %376 = vperm.xlu0 %1790, %v368_v33   ;;  %382 = vperm.xlu1 %1791, %v370_v34  }
 0x30f   :  { %1794 = vrot.lane.b32.xlu2 %v2324_v35, %s2015_s28 }
 0x316   :  { %1799 = vrot.lane.b32.xlu1 %v2329_v36, %s2015_s28  ;;  %s2024_s28 = smov 128  }
 0x319   :  { %v409_v37 = vpop.permute.xlu2 %408 }
 0x321   :  { %v576_v38 = vpop.permute.xlu2 %575 }
 0x329   :  { %v407_v39 = vpop.permute.xlu0 %406  ;;  %v568_v41 = vpop.permute.xlu2 %567 }
 0x330   :  { %v411_v40 = vpop.permute.xlu1 %410 }
 0x331   :  { %v740_v44 = vpop.permute.xlu2 %739 }
 0x338   :  { %v580_v42 = vpop.permute.xlu1 %579  ;;  %v413_v43 = vpop.permute.xlu0 %412 }
 0x339   :  { %1664 = vmatpush.xpose.msk.msrb.mxu2 %vm414_vm13, %v413_v43  ;;  %1676 = vmatpush.xpose.msk.msrb.mxu1 %vm414_vm13, %v580_v42  ;;  %v912_v49 = vpop.permute.xlu2 %911 }
 0x33d   :  { %1665 = vmatpush.xpose.msk.msrb.mxu2 %vm414_vm13, %v411_v40 }
 0x340   :  { %v574_v45 = vpop.permute.xlu1 %573  ;;  %v578_v46 = vpop.permute.xlu0 %577 }
 0x341   :  { %1666 = vmatpush.xpose.msk.msrb.mxu2 %vm414_vm13, %v409_v37  ;;  %1677 = vmatpush.xpose.msk.msrb.mxu1 %vm414_vm13, %v578_v46  ;;  %v572_v52 = vpop.permute.xlu2 %571 }
 0x345   :  { %1667 = vmatpush.xpose.msk.msrb.mxu2 %vm414_vm13, %v407_v39  ;;  %1678 = vmatpush.xpose.msk.msrb.mxu1 %vm414_vm13, %v576_v38 }
 0x348   :  { %v570_v47 = vpop.permute.xlu1 %569  ;;  %1668 = vmatmul.msk.f32.vlgmr.msrb.gmra.mxu2 %vm414_vm13, %v2274_v24  ;;  %v566_v48 = vpop.permute.xlu0 %565 }
 0x349   :  { %1679 = vmatpush.xpose.msk.msrb.mxu1 %vm414_vm13, %v574_v45  ;;  %v898_v57 = vpop.permute.xlu2 %897 }
 0x34c   :  { %1680 = vmatmul.msk.f32.vlgmr.msrb.gmra.mxu1 %vm414_vm13, %v566_v48 }
 0x34d   :  { %1700 = vmatpush.xpose.msk.msra.mxu1 %vm414_vm13, %v912_v49 }
 0x350   :  { %v744_v50 = vpop.permute.xlu1 %743  ;;  %1669 = vmatmul.msk.f32.gmra.mxu2 %vm414_vm13, %v2279_v28  ;;  %v910_v51 = vpop.permute.xlu0 %909 }
 0x351   :  { %1701 = vmatpush.xpose.msk.msra.mxu1 %vm414_vm13, %v910_v51  ;;  %v736_v60 = vpop.permute.xlu2 %735 }
 0x354   :  { %1681 = vmatmul.msk.f32.gmra.mxu1 %vm414_vm13, %v568_v41 }
 0x358   :  { %v742_v53 = vpop.permute.xlu1 %741  ;;  %1670 = vmatmul.msk.f32.gmra.mxu2 %vm414_vm13, %v2277_v26  ;;  %v908_v54 = vpop.permute.xlu0 %907 }
 0x359   :  { %1702 = vmatpush.xpose.msk.msra.mxu1 %vm414_vm13, %v908_v54  ;;  %v904_v1 = vpop.permute.xlu2 %903 }
 0x35c   :  { %1682 = vmatmul.msk.f32.gmra.mxu1 %vm414_vm13, %v570_v47 }
 0x360   :  { %v906_v55 = vpop.permute.xlu1 %905  ;;  %1671 = vmatmul.msk.f32.gmra.mxu2 %vm414_vm13, %v2283_v30  ;;  %v732_v56 = vpop.permute.xlu0 %731 }
 0x361   :  { %1703 = vmatpush.xpose.msk.msra.mxu1 %vm414_vm13, %v906_v55  ;;  %v380_v8 = vpop.permute.xlu2 %379 }
 0x362   :  { %vm387_vm7 = vcmp.eq.s32.totalorder %v380_v8, %v1868_v7 }
 0x363   :  { %vm396_vm8 = vmand %vm387_vm7, %vm2372_vm15 }
 0x364   :  { %1683 = vmatmul.msk.f32.gmra.mxu1 %vm414_vm13, %v572_v52  ;;  %v400_v41 = vsel %vm396_vm8, 0.0, %v2016_v2 }
 0x368   :  { %v734_v58 = vpop.permute.xlu1 %733  ;;  %v746_v59 = vpop.permute.xlu0 %745 }
 0x369   :  { %1688 = vmatpush.xpose.msk.msrb.mxu0 %vm414_vm13, %v746_v59  ;;  %v1795_v9 = vpop.permute.xlu2 %1794 }
 0x36a   :  { %v1796_v21 = vunpack.i.l.bf16 %v1795_v9  ;;  %v1797_v23 = vunpack.i.h.bf16 %v1795_v9 }
 0x36c   :  { %1704 = vmatmul.msk.f32.vlgmr.msra.gmra.mxu1 %vm414_vm13, %v898_v57 }
 0x36d   :  { %1689 = vmatpush.xpose.msk.msrb.mxu0 %vm414_vm13, %v744_v50 }
 0x370   :  { %v902_v61 = vpop.permute.xlu1 %901  ;;  %v900_v62 = vpop.permute.xlu0 %899 }
 0x371   :  { %1690 = vmatpush.xpose.msk.msrb.mxu0 %vm414_vm13, %v742_v53 }
 0x374   :  { %1705 = vmatmul.msk.f32.gmra.mxu1 %vm414_vm13, %v900_v62 }
 0x375   :  { %1691 = vmatpush.xpose.msk.msrb.mxu0 %vm414_vm13, %v740_v44 }
 0x378   :  { %v374_v3 = vpop.permute.xlu1 %373  ;;  %1692 = vmatmul.msk.f32.vlgmr.msrb.gmra.mxu0 %vm414_vm13, %v732_v56  ;;  %v738_v18 = vpop.permute.xlu0 %737 }
 0x379   :  { %vm385_vm2 = vcmp.eq.s32.totalorder %v374_v3, %v1868_v7 }
 0x37a   :  { %vm394_vm3 = vmand %vm385_vm2, %vm2372_vm15 }
 0x37b   :  { %v2385_v27 = vsel %vm394_vm3, 0.0, %v2016_v2 }
 0x37c   :  { %1706 = vmatmul.msk.f32.gmra.mxu1 %vm414_vm13, %v902_v61 }
 0x380   :  { %v383_v10 = vpop.permute.xlu1 %382  ;;  %1693 = vmatmul.msk.f32.gmra.mxu0 %vm414_vm13, %v734_v58  ;;  %v377_v25 = vpop.permute.xlu0 %376 }
 0x381   :  { %vm388_vm0 = vcmp.eq.s32.totalorder %v383_v10, %v1868_v7  ;;  %vm386_vm4 = vcmp.eq.s32.totalorder %v377_v25, %v1868_v7 }
 0x382   :  { %vm397_vm1 = vmand %vm388_vm0, %vm2372_vm15 }
 0x383   :  { %v2378_v11 = vsel %vm397_vm1, 0.0, %v2016_v2  ;;  %vm395_vm5 = vmand %vm386_vm4, %vm2372_vm15 }
 0x384   :  { %1707 = vmatmul.msk.f32.gmra.mxu1 %vm414_vm13, %v904_v1  ;;  %v2394_v33 = vsel %vm395_vm5, 0.0, %v2016_v2 }
 0x388   :  { %v1800_v12 = vpop.permute.xlu1 %1799  ;;  %1694 = vmatmul.msk.f32.gmra.mxu0 %vm414_vm13, %v736_v60 }
 0x389   :  { %v1801_v13 = vunpack.i.l.bf16 %v1800_v12  ;;  %v1802_v17 = vunpack.i.h.bf16 %v1800_v12 }
 0x38b   :  { %548 = vmatpush.msra.mxu3 %v1801_v13 }
 0x38d   :  { %549 = vmatpush.msra.mxu3 %v1802_v17 }
 0x38f   :  { %550 = vmatpush.msra.mxu3 %v1796_v21 }
 0x390   :  { %1695 = vmatmul.msk.f32.gmra.mxu0 %vm414_vm13, %v738_v18 }
 0x391   :  { %551 = vmatpush.msra.mxu3 %v1797_v23 }
 0x3c9   :  { %v614_v24 = vpop.f32.mrf.mxu1 }
 0x3ca   :  { %v626_v26 = vmul.f32 0.35355338, %v614_v24 }
 0x3cb   :  { %v448_v28 = vpop.f32.mrf.mxu2 }
 0x3cc   :  { %v2388_v29 = vadd.f32 %v626_v26, %v2385_v27  ;;  %v460_v47 = vmul.f32 0.35355338, %v448_v28 }
 0x3ce   :  { %v634_v30 = vsel %vm210_vm10, %v2388_v29, -inf  ;;  %v2415_v52 = vadd.f32 %v460_v47, %v2385_v27 }
 0x3cf   :  { %635 = vmax.xlane.f32.xlu2 %v634_v30 }
 0x3d0   :  { %v468_v56 = vsel %vm210_vm10, %v2415_v52, -inf }
 0x3d1   :  { %v617_v31 = vpop.f32.mrf.mxu1 }
 0x3d2   :  { %v627_v32 = vmul.f32 0.35355338, %v617_v31 }
 0x3d3   :  { %v451_v34 = vpop.f32.mrf.mxu2 }
 0x3d4   :  { %v2397_v37 = vadd.f32 %v627_v32, %v2394_v33  ;;  %v461_v54 = vmul.f32 0.35355338, %v451_v34 }
 0x3d6   :  { %v637_v38 = vsel %vm210_vm10, %v2397_v37, -inf  ;;  %v2427_v60 = vadd.f32 %v461_v54, %v2394_v33 }
 0x3d7   :  { %638 = vmax.xlane.f32.xlu1 %v637_v38 }
 0x3d8   :  { %v471_v1 = vsel %vm210_vm10, %v2427_v60, -inf }
 0x3d9   :  { %v620_v49 = vpop.f32.mrf.mxu1 }
 0x3da   :  { %v628_v55 = vmul.f32 0.35355338, %v620_v49 }
 0x3db   :  { %v454_v39 = vpop.f32.mrf.mxu2 }
 0x3dc   :  { %v462_v40 = vmul.f32 0.35355338, %v454_v39  ;;  %v2424_v59 = vadd.f32 %v628_v55, %v400_v41 }
 0x3de   :  { %v2403_v42 = vadd.f32 %v462_v40, %v400_v41  ;;  %v640_v63 = vsel %vm210_vm10, %v2424_v59, -inf }
 0x3e0   :  { %v474_v43 = vsel %vm210_vm10, %v2403_v42, -inf }
 0x3e1   :  { %475 = vmax.xlane.f32.xlu1 %v474_v43  ;;  %v623_v61 = vpop.f32.mrf.mxu1 }
 0x3e2   :  { %v629_v10 = vmul.f32 0.35355338, %v623_v61 }
 0x3e3   :  { %v457_v13 = vpop.f32.mrf.mxu2 }
 0x3e4   :  { %v633_v12 = vadd.f32 %v629_v10, %v2378_v11  ;;  %v463_v9 = vmul.f32 0.35355338, %v457_v13 }
 0x3e6   :  { %v643_v17 = vsel %vm210_vm10, %v633_v12, -inf  ;;  %v2445_v23 = vadd.f32 %v463_v9, %v2378_v11 }
 0x3e8   :  { %v477_v26 = vsel %vm210_vm10, %v2445_v23, -inf }
 0x3e9   :  { %v946_v8 = vpop.f32.mrf.mxu1 }
 0x3ea   :  { %v958_v21 = vmul.f32 0.35355338, %v946_v8 }
 0x3ec   :  { %v2448_v24 = vadd.f32 %v958_v21, %v2385_v27 }
 0x3ee   :  { %v966_v28 = vsel %vm210_vm10, %v2448_v24, -inf }
 0x3f1   :  { %v949_v18 = vpop.f32.mrf.mxu1 }
 0x3f2   :  { %v959_v25 = vmul.f32 0.35355338, %v949_v18 }
 0x3f4   :  { %v2455_v31 = vadd.f32 %v959_v25, %v2394_v33 }
 0x3f5   :  { %v780_v44 = vpop.f32.mrf.mxu0 }
 0x3f6   :  { %v792_v45 = vmul.f32 0.35355338, %v780_v44  ;;  %v969_v34 = vsel %vm210_vm10, %v2455_v31, -inf }
 0x3f8   :  { %v2408_v46 = vadd.f32 %v792_v45, %v2385_v27 }
 0x3f9   :  { %v952_v30 = vpop.f32.mrf.mxu1 }
 0x3fa   :  { %1804 = vrot.lane.b32.xlu1 %v2329_v36, %s2017_s0  ;;  %v800_v48 = vsel %vm210_vm10, %v2408_v46, -inf  ;;  %v960_v32 = vmul.f32 0.35355338, %v952_v30 }
 0x3fb   :  { %801 = vmax.xlane.f32.xlu0 %v800_v48 }
 0x3fc   :  { %v2459_v27 = vadd.f32 %v960_v32, %v400_v41 }
 0x3fd   :  { %v783_v50 = vpop.f32.mrf.mxu0 }
 0x3fe   :  { %v793_v51 = vmul.f32 0.35355338, %v783_v50  ;;  %v972_v40 = vsel %vm210_vm10, %v2459_v27, -inf }
 0x400   :  { %v2418_v53 = vadd.f32 %v793_v51, %v2394_v33 }
 0x401   :  { %v955_v38 = vpop.f32.mrf.mxu1 }
 0x402   :  { %v803_v57 = vsel %vm210_vm10, %v2418_v53, -inf  ;;  %v961_v39 = vmul.f32 0.35355338, %v955_v38 }
 0x403   :  { %469 = vmax.xlane.f32.xlu0 %v468_v56  ;;  %804 = vmax.xlane.f32.xlu2 %v803_v57 }
 0x404   :  { %v2464_v43 = vadd.f32 %v961_v39, %v2378_v11 }
 0x405   :  { %v786_v58 = vpop.f32.mrf.mxu0 }
 0x406   :  { %v794_v62 = vmul.f32 0.35355338, %v786_v58  ;;  %v975_v33 = vsel %vm210_vm10, %v2464_v43, -inf }
 0x408   :  { %v2433_v6 = vadd.f32 %v794_v62, %v400_v41 }
 0x40a   :  { %v806_v4 = vsel %vm210_vm10, %v2433_v6, -inf }
 0x40b   :  { %641 = vmax.xlane.f32.xlu0 %v640_v63  ;;  %472 = vmax.xlane.f32.xlu2 %v471_v1 }
 0x40d   :  { %v789_v3 = vpop.f32.mrf.mxu0 }
 0x40e   :  { %v795_v5 = vmul.f32 0.35355338, %v789_v3 }
 0x410   :  { %v2436_v7 = vadd.f32 %v795_v5, %v2378_v11 }
 0x412   :  { %v809_v2 = vsel %vm210_vm10, %v2436_v7, -inf }
 0x413   :  { %807 = vmax.xlane.f32.xlu0 %v806_v4  ;;  %810 = vmax.xlane.f32.xlu2 %v809_v2 }
 0x41b   :  { %644 = vmax.xlane.f32.xlu0 %v643_v17 }
 0x423   :  { %478 = vmax.xlane.f32.xlu0 %v477_v26 }
 0x424   :  { %967 = vmax.xlane.f32.xlu1 %v966_v28 }
 0x42b   :  { %970 = vmax.xlane.f32.xlu0 %v969_v34 }
 0x433   :  { %973 = vmax.xlane.f32.xlu0 %v972_v40 }
 0x43b   :  { %976 = vmax.xlane.f32.xlu0 %v975_v33 }
 0x442   :  { %v636_v44 = vpop.xlane.xlu2 %635 }
 0x443   :  { %v646_v45 = vsub.f32 %v2388_v29, %v636_v44 }
 0x445   :  { %v650_v47 = vmul.f32 1.442695, %v646_v45 }
 0x447   :  { %1887 = vpow2.f32 %v650_v47 }
 0x44a   :  { %v639_v49 = vpop.xlane.xlu1 %638 }
 0x44b   :  { %v647_v9 = vsub.f32 %v2397_v37, %v639_v49 }
 0x44d   :  { %v2469_v41 = vpop.eup %1887  ;;  %v652_v17 = vmul.f32 1.442695, %v647_v9 }
 0x44e   :  { %v658_v48 = vsel %vm210_vm10, %v2469_v41, 0.0 }
 0x44f   :  { %659 = vadd.xlane.f32.xlu0 %v658_v48 }
 0x454   :  { %v476_v50 = vpop.xlane.xlu1 %475 }
 0x46c   :  { %v1805_v51 = vpop.permute.xlu1 %1804 }
 0x46d   :  { %v1806_v11 = vunpack.i.l.bf16 %v1805_v51  ;;  %v1807_v56 = vunpack.i.h.bf16 %v1805_v51 }
 0x46e   :  { %v802_v54 = vpop.xlane.xlu0 %801 }
 0x46f   :  { %v812_v55 = vsub.f32 %v2408_v46, %v802_v54  ;;  %714 = vmatpush.msrb.mxu3 %v1806_v11 }
 0x471   :  { %v816_v57 = vmul.f32 1.442695, %v812_v55  ;;  %715 = vmatpush.msrb.mxu3 %v1807_v56 }
 0x473   :  { %1889 = vpow2.f32 %v816_v57 }
 0x476   :  { %v470_v29 = vpop.xlane.xlu0 %469  ;;  %v2492_v13 = vpop.xlane.xlu2 %804 }
 0x477   :  { %v480_v58 = vsub.f32 %v2415_v52, %v470_v29 }
 0x479   :  { %v2475_v61 = vpop.eup %1889  ;;  %v484_v62 = vmul.f32 1.442695, %v480_v58 }
 0x47a   :  { %v824_v63 = vsel %vm210_vm10, %v2475_v61, 0.0 }
 0x47b   :  { %825 = vadd.xlane.f32.xlu0 %v824_v63  ;;  %1891 = vpow2.f32 %v484_v62 }
 0x47e   :  { %v642_v1 = vpop.xlane.xlu0 %641 }
 0x47f   :  { %v648_v30 = vsub.f32 %v2424_v59, %v642_v1 }
 0x481   :  { %v2479_v3 = vpop.eup %1891  ;;  %v654_v34 = vmul.f32 1.442695, %v648_v30 }
 0x482   :  { %v492_v46 = vsel %vm210_vm10, %v2479_v3, 0.0 }
 0x483   :  { %493 = vadd.xlane.f32.xlu2 %v492_v46 }
 0x486   :  { %v2483_v5 = vpop.xlane.xlu0 %807 }
 0x487   :  { %v814_v62 = vsub.f32 %v2433_v6, %v2483_v5  ;;  %v813_v6 = vsub.f32 %v2418_v53, %v2492_v13 }
 0x489   :  { %v820_v1 = vmul.f32 1.442695, %v814_v62 }
 0x48e   :  { %v645_v8 = vpop.xlane.xlu0 %644 }
 0x48f   :  { %v649_v10 = vsub.f32 %v633_v12, %v645_v8  ;;  %1814 = vrot.lane.b32.xlu0 %v2329_v36, %s2018_s4  ;;  %v473_v12 = vpop.xlane.xlu2 %472 }
 0x490   :  { %v481_v21 = vsub.f32 %v2427_v60, %v473_v12  ;;  %v482_v60 = vsub.f32 %v2403_v42, %v476_v50 }
 0x491   :  { %v656_v52 = vmul.f32 1.442695, %v649_v10 }
 0x492   :  { %v486_v25 = vmul.f32 1.442695, %v481_v21  ;;  %v488_v59 = vmul.f32 1.442695, %v482_v60 }
 0x493   :  { %1893 = vpow2.f32 %v656_v52 }
 0x494   :  { %1895 = vpow2.f32 %v652_v17 }
 0x495   :  { %1897 = vpow2.f32 %v486_v25 }
 0x497   :  { %v968_v18 = vpop.xlane.xlu1 %967  ;;  %v811_v29 = vpop.xlane.xlu2 %810 }
 0x498   :  { %v978_v26 = vsub.f32 %v2448_v24, %v968_v18  ;;  %v479_v24 = vpop.xlane.xlu0 %478  ;;  %v815_v21 = vsub.f32 %v2436_v7, %v811_v29 }
 0x499   :  { %v2486_v4 = vpop.eup %1893  ;;  %v483_v45 = vsub.f32 %v2445_v23, %v479_v24 }
 0x49a   :  { %v667_v2 = vsel %vm210_vm10, %v2486_v4, 0.0  ;;  %v2498_v28 = vpop.eup %1895  ;;  %v982_v32 = vmul.f32 1.442695, %v978_v26  ;;  %v822_v18 = vmul.f32 1.442695, %v815_v21 }
 0x49b   :  { %668 = vadd.xlane.f32.xlu1 %v667_v2  ;;  %1809 = vrot.lane.b32.xlu2 %v2324_v35, %s2017_s0  ;;  %v661_v37 = vsel %vm210_vm10, %v2498_v28, 0.0  ;;  %v2503_v38 = vpop.eup %1897  ;;  %v490_v48 = vmul.f32 1.442695, %v483_v45 }
 0x49c   :  { %1899 = vpow2.f32 %v982_v32  ;;  %v495_v39 = vsel %vm210_vm10, %v2503_v38, 0.0 }
 0x49d   :  { %1901 = vpow2.f32 %v654_v34 }
 0x49e   :  { %1903 = vpow2.f32 %v488_v59 }
 0x49f   :  { %1905 = vpow2.f32 %v490_v48 }
 0x4a0   :  { %v971_v47 = vpop.xlane.xlu0 %970 }
 0x4a1   :  { %v979_v49 = vsub.f32 %v2455_v31, %v971_v47 }
 0x4a2   :  { %v2508_v40 = vpop.eup %1899 }
 0x4a3   :  { %v990_v33 = vsel %vm210_vm10, %v2508_v40, 0.0  ;;  %v2512_v44 = vpop.eup %1901  ;;  %v984_v51 = vmul.f32 1.442695, %v979_v49 }
 0x4a4   :  { %v664_v42 = vsel %vm210_vm10, %v2512_v44, 0.0  ;;  %v2518_v50 = vpop.eup %1903 }
 0x4a5   :  { %v498_v11 = vsel %vm210_vm10, %v2518_v50, 0.0  ;;  %1907 = vpow2.f32 %v984_v51  ;;  %v2522_v54 = vpop.eup %1905 }
 0x4a6   :  { %v501_v23 = vsel %vm210_vm10, %v2522_v54, 0.0 }
 0x4a8   :  { %v974_v56 = vpop.xlane.xlu0 %973 }
 0x4a9   :  { %v980_v26 = vsub.f32 %v2459_v27, %v974_v56 }
 0x4ab   :  { %v2526_v55 = vpop.eup %1907  ;;  %v986_v53 = vmul.f32 1.442695, %v980_v26 }
 0x4ac   :  { %v993_v31 = vsel %vm210_vm10, %v2526_v55, 0.0 }
 0x4b0   :  { %v977_v57 = vpop.xlane.xlu0 %976 }
 0x4b1   :  { %v981_v32 = vsub.f32 %v2464_v43, %v977_v57 }
 0x4b3   :  { %v988_v34 = vmul.f32 1.442695, %v981_v32 }
 0x4b4   :  { %1824 = vrot.lane.b32.xlu1 %v2324_v35, %s2018_s4 }
 0x4b9   :  { %662 = vadd.xlane.f32.xlu0 %v661_v37 }
 0x4c1   :  { %496 = vadd.xlane.f32.xlu0 %v495_v39 }
 0x4c2   :  { %v2532_v58 = vpop.xlane.xlu0 %659 }
 0x4c4   :  { %991 = vadd.xlane.f32.xlu2 %v990_v33 }
 0x4c9   :  { %665 = vadd.xlane.f32.xlu0 %v664_v42 }
 0x4d1   :  { %499 = vadd.xlane.f32.xlu0 %v498_v11 }
 0x4d9   :  { %502 = vadd.xlane.f32.xlu0 %v501_v23 }
 0x4dc   :  { %1829 = vrot.lane.b32.xlu2 %v2324_v35, %s2019_s30 }
 0x4de   :  { %994 = vadd.xlane.f32.xlu1 %v993_v31 }
 0x4ed   :  { %1819 = vrot.lane.b32.xlu0 %v2329_v36, %s2019_s30 }
 0x4ee   :  { %v826_v46 = vpop.xlane.xlu0 %825 }
 0x4f6   :  { %v494_v63 = vpop.xlane.xlu2 %493 }
 0x4f7   :  { %1909 = vrcp.f32 %v494_v63 }
 0x4f8   :  { %1911 = vpow2.f32 %v820_v1 }
 0x4fd   :  { %v1910_v35 = vpop.eup %1909 }
 0x4fe   :  { %v1810_v8 = vpop.permute.xlu2 %1809  ;;  %v508_v10 = vmul.f32 %v1910_v35, %v2479_v3  ;;  %v2538_v36 = vpop.eup %1911  ;;  %v818_v3 = vmul.f32 1.442695, %v813_v6 }
 0x4ff   :  { %v1811_v52 = vunpack.i.l.bf16 %v1810_v8  ;;  %v1812_v17 = vunpack.i.h.bf16 %v1810_v8  ;;  %v830_v5 = vsel %vm210_vm10, %v2538_v36, 0.0 }
 0x500   :  { %1672 = vmatmul.msk.f32.vlgmr.msra.gmra.mxu3 %vm210_vm10, %v508_v10  ;;  %1913 = vpow2.f32 %v818_v3 }
 0x501   :  { %v1815_v2 = vpop.permute.xlu0 %1814  ;;  %716 = vmatpush.msrb.mxu3 %v1811_v52  ;;  %1915 = vpow2.f32 %v822_v18 }
 0x502   :  { %v1816_v9 = vunpack.i.l.bf16 %v1815_v2  ;;  %v1817_v12 = vunpack.i.h.bf16 %v1815_v2  ;;  %1917 = vpow2.f32 %v986_v53 }
 0x503   :  { %717 = vmatpush.msrb.mxu3 %v1812_v17  ;;  %1919 = vrcp.f32 %v826_v46 }
 0x504   :  { %880 = vmatpush.msra.mxu2 %v1816_v9  ;;  %1921 = vpow2.f32 %v988_v34 }
 0x505   :  { %831 = vadd.xlane.f32.xlu2 %v830_v5 }
 0x506   :  { %881 = vmatpush.msra.mxu2 %v1817_v12  ;;  %v2545_v25 = vpop.eup %1913 }
 0x507   :  { %v827_v30 = vsel %vm210_vm10, %v2545_v25, 0.0  ;;  %v2550_v13 = vpop.eup %1915 }
 0x508   :  { %v833_v7 = vsel %vm210_vm10, %v2550_v13, 0.0  ;;  %v2555_v60 = vpop.eup %1917 }
 0x509   :  { %v996_v24 = vsel %vm210_vm10, %v2555_v60, 0.0  ;;  %v1920_v39 = vpop.eup %1919 }
 0x50a   :  { %v840_v43 = vmul.f32 %v1920_v39, %v2475_v61  ;;  %v2560_v45 = vpop.eup %1921 }
 0x50b   :  { %v999_v47 = vsel %vm210_vm10, %v2560_v45, 0.0 }
 0x50e   :  { %v669_v37 = vpop.xlane.xlu1 %668 }
 0x517   :  { %828 = vadd.xlane.f32.xlu0 %v827_v30 }
 0x51f   :  { %834 = vadd.xlane.f32.xlu0 %v833_v7 }
 0x526   :  { %v1825_v27 = vpop.permute.xlu1 %1824 }
 0x527   :  { %v1826_v59 = vunpack.i.l.bf16 %v1825_v27  ;;  %997 = vadd.xlane.f32.xlu0 %v996_v24  ;;  %v1827_v33 = vunpack.i.h.bf16 %v1825_v27 }
 0x529   :  { %882 = vmatpush.msra.mxu2 %v1826_v59 }
 0x52b   :  { %883 = vmatpush.msra.mxu2 %v1827_v33 }
 0x52c   :  { %v663_v42 = vpop.xlane.xlu0 %662  ;;  %1696 = vmatmul.msk.f32.vlgmr.msra.gmra.mxu2 %vm210_vm10, %v840_v43 }
 0x52f   :  { %1000 = vadd.xlane.f32.xlu0 %v999_v47 }
 0x534   :  { %v497_v48 = vpop.xlane.xlu0 %496 }
 0x535   :  { %1923 = vrcp.f32 %v497_v48 }
 0x537   :  { %v992_v62 = vpop.xlane.xlu2 %991 }
 0x53b   :  { %v1924_v49 = vpop.eup %1923 }
 0x53c   :  { %v666_v51 = vpop.xlane.xlu0 %665  ;;  %v509_v11 = vmul.f32 %v1924_v49, %v2503_v38 }
 0x53e   :  { %1673 = vmatmul.msk.f32.gmra.mxu3 %vm210_vm10, %v509_v11 }
 0x53f   :  { %v1830_v35 = vpop.permute.xlu2 %1829 }
 0x540   :  { %v1832_v10 = vunpack.i.h.bf16 %v1830_v35 }
 0x544   :  { %v500_v23 = vpop.xlane.xlu0 %499 }
 0x545   :  { %1925 = vrcp.f32 %v500_v23 }
 0x54b   :  { %v1926_v61 = vpop.eup %1925 }
 0x54c   :  { %v503_v31 = vpop.xlane.xlu0 %502  ;;  %v510_v56 = vmul.f32 %v1926_v61, %v2518_v50 }
 0x54d   :  { %1927 = vrcp.f32 %v503_v31 }
 0x54e   :  { %1674 = vmatmul.msk.f32.gmra.mxu3 %vm210_vm10, %v510_v56  ;;  %1929 = vrcp.f32 %v2532_v58 }
 0x54f   :  { %1931 = vrcp.f32 %v663_v42 }
 0x550   :  { %1933 = vrcp.f32 %v666_v51 }
 0x551   :  { %1935 = vrcp.f32 %v669_v37  ;;  %v995_v17 = vpop.xlane.xlu1 %994 }
 0x552   :  { %1937 = vrcp.f32 %v992_v62  ;;  %v1761_v62 = vld [vmem:[%s2778_s13 + $0x8] sm:$0xff] }
 0x553   :  { %v1928_v57 = vpop.eup %1927  ;;  %1939 = vrcp.f32 %v995_v17  ;;  %1159 = vmatpush.bf16.msra.mxu0 %v1761_v62 }
 0x554   :  { %v511_v29 = vmul.f32 %v1928_v57, %v2522_v54  ;;  %v1930_v38 = vpop.eup %1929  ;;  %v1831_v54 = vunpack.i.l.bf16 %v1830_v35 }
 0x555   :  { %v674_v63 = vmul.f32 %v1930_v38, %v2469_v41  ;;  %v1932_v50 = vpop.eup %1931  ;;  %v1760_v38 = vld [vmem:[%s2778_s13] sm:$0xff] }
 0x556   :  { %1675 = vmatmul.msk.f32.gmra.mxu3 %vm210_vm10, %v511_v29  ;;  %v675_v58 = vmul.f32 %v1932_v50, %v2498_v28  ;;  %v1934_v52 = vpop.eup %1933 }
 0x557   :  { %v676_v41 = vmul.f32 %v1934_v52, %v2512_v44  ;;  %v1936_v2 = vpop.eup %1935  ;;  %1160 = vmatpush.bf16.msra.mxu0 %v1760_v38 }
 0x558   :  { %v677_v9 = vmul.f32 %v1936_v2, %v2486_v4  ;;  %v1938_v28 = vpop.eup %1937 }
 0x559   :  { %v1006_v12 = vmul.f32 %v1938_v28, %v2508_v40  ;;  %v1940_v6 = vpop.eup %1939 }
 0x55a   :  { %v1007_v5 = vmul.f32 %v1940_v6, %v2526_v55 }
 0x55e   :  { %1684 = vmatmul.msk.f32.vlgmr.msrb.gmra.mxu3 %vm210_vm10, %v674_v63 }
 0x55f   :  { %v1820_v1 = vpop.permute.xlu0 %1819 }
 0x560   :  { %v1821_v46 = vunpack.i.l.bf16 %v1820_v1  ;;  %v1822_v8 = vunpack.i.h.bf16 %v1820_v1 }
 0x562   :  { %1046 = vmatpush.msra.mxu3 %v1821_v46 }
 0x564   :  { %1047 = vmatpush.msra.mxu3 %v1822_v8 }
 0x566   :  { %1685 = vmatmul.msk.f32.gmra.mxu3 %vm210_vm10, %v675_v58 }
 0x567   :  { %1048 = vmatpush.msra.mxu3 %v1831_v54 }
 0x569   :  { %1049 = vmatpush.msra.mxu3 %v1832_v10 }
 0x56e   :  { %1686 = vmatmul.msk.f32.gmra.mxu3 %vm210_vm10, %v676_v41 }
 0x576   :  { %1687 = vmatmul.msk.f32.gmra.mxu3 %vm210_vm10, %v677_v9 }
 0x578   :  { %v832_v3 = vpop.xlane.xlu2 %831 }
 0x57e   :  { %1708 = vmatmul.msk.f32.vlgmr.msra.gmra.mxu3 %vm210_vm10, %v1006_v12 }
 0x586   :  { %1709 = vmatmul.msk.f32.gmra.mxu3 %vm210_vm10, %v1007_v5 }
 0x58a   :  { %v829_v44 = vpop.xlane.xlu0 %828 }
 0x58b   :  { %1941 = vrcp.f32 %v829_v44 }
 0x58c   :  { %1943 = vrcp.f32 %v832_v3 }
 0x591   :  { %v1942_v21 = vpop.eup %1941 }
 0x592   :  { %v835_v4 = vpop.xlane.xlu0 %834  ;;  %v841_v18 = vmul.f32 %v1942_v21, %v2545_v25  ;;  %v1944_v26 = vpop.eup %1943 }
 0x593   :  { %1945 = vrcp.f32 %v835_v4  ;;  %v842_v30 = vmul.f32 %v1944_v26, %v2538_v36  ;;  %v553_v36 = vpop.f32.mrf.mxu3 }
 0x594   :  { %1697 = vmatmul.msk.f32.gmra.mxu2 %vm210_vm10, %v841_v18 }
 0x599   :  { %v1946_v55 = vpop.eup %1945 }
 0x59a   :  { %v998_v40 = vpop.xlane.xlu0 %997  ;;  %v843_v37 = vmul.f32 %v1946_v55, %v2550_v13 }
 0x59b   :  { %1947 = vrcp.f32 %v998_v40 }
 0x59c   :  { %1698 = vmatmul.msk.f32.gmra.mxu2 %vm210_vm10, %v842_v30 }
 0x5a1   :  { %v1948_v53 = vpop.eup %1947 }
 0x5a2   :  { %v1001_v32 = vpop.xlane.xlu0 %1000  ;;  %v1008_v7 = vmul.f32 %v1948_v53, %v2555_v60 }
 0x5a3   :  { %1949 = vrcp.f32 %v1001_v32 }
 0x5a4   :  { %1699 = vmatmul.msk.f32.gmra.mxu2 %vm210_vm10, %v843_v37  ;;  %1710 = vmatmul.msk.f32.gmra.mxu3 %vm210_vm10, %v1008_v7 }
 0x5a9   :  { %v1950_v25 = vpop.eup %1949 }
 0x5aa   :  { %v1009_v34 = vmul.f32 %v1950_v25, %v2560_v45 }
 0x5ac   :  { %1711 = vmatmul.msk.f32.gmra.mxu3 %vm210_vm10, %v1009_v34  ;;  %v1869_v34 = vld [vmem:[%s2779_s14] ss:$0 sm:$0xff] }
 0x5af   :  { %v885_v49 = vpop.f32.mrf.mxu2 }
 0x5c1   :  { %v556_v27 = vpop.f32.mrf.mxu3 }
 0x5d1   :  { %v559_v24 = vpop.f32.mrf.mxu3 }
 0x5d9   :  { %v562_v39 = vpop.f32.mrf.mxu3 }
 0x5e1   :  { %v719_v59 = vpop.f32.mrf.mxu3 }
 0x5e9   :  { %v722_v33 = vpop.f32.mrf.mxu3 }
 0x5ea   :  { %v1833_v43 = vpack.i.bf16 %v722_v33, %v719_v59 }
 0x5ec   :  { %1834 = vrot.lane.b32.xlu0 %v1833_v43, %s2020_s24 }
 0x5f1   :  { %v725_v13 = vpop.f32.mrf.mxu3 }
 0x5f9   :  { %v728_v60 = vpop.f32.mrf.mxu3 }
 0x5fa   :  { %v1848_v42 = vpack.i.bf16 %v728_v60, %v725_v13 }
 0x5fc   :  { %1849 = vrot.lane.b32.xlu0 %v1848_v42, %s2020_s24 }
 0x601   :  { %v1051_v47 = vpop.f32.mrf.mxu3 }
 0x609   :  { %v1054_v48 = vpop.f32.mrf.mxu3 }
 0x60a   :  { %v1843_v45 = vpack.i.bf16 %v1054_v48, %v1051_v47 }
 0x60c   :  { %1844 = vrot.lane.b32.xlu2 %v1843_v45, %s2021_s25 }
 0x617   :  { %v888_v51 = vpop.f32.mrf.mxu2 }
 0x618   :  { %v1838_v11 = vpack.i.bf16 %v888_v51, %v885_v49 }
 0x61a   :  { %1839 = vrot.lane.b32.xlu1 %v1838_v11, %s2022_s8 }
 0x61f   :  { %v891_v23 = vpop.f32.mrf.mxu2 }
 0x627   :  { %v894_v61 = vpop.f32.mrf.mxu2  ;;  %v1057_v31 = vpop.f32.mrf.mxu3 }
 0x628   :  { %v1853_v56 = vpack.i.bf16 %v894_v61, %v891_v23 }
 0x62a   :  { %1854 = vrot.lane.b32.xlu1 %v1853_v56, %s2022_s8 }
 0x62f   :  { %v1060_v57 = vpop.f32.mrf.mxu3 }
 0x630   :  { %v1858_v29 = vpack.i.bf16 %v1060_v57, %v1057_v31 }
 0x632   :  { %1859 = vrot.lane.b32.xlu0 %v1858_v29, %s2021_s25 }
 0x65e   :  { %v1835_v63 = vpop.permute.xlu0 %1834 }
 0x65f   :  { %v1837_v1 = vunpack.i.h.bf16 %v1835_v63  ;;  %v1836_v46 = vunpack.i.l.bf16 %v1835_v63 }
 0x661   :  { %v1112_v54 = vsel %vm414_vm13, %v556_v27, %v1837_v1  ;;  %v1111_v10 = vsel %vm414_vm13, %v553_v36, %v1836_v46 }
 0x666   :  { %v1845_v50 = vpop.permute.xlu2 %1844 }
 0x667   :  { %v1847_v52 = vunpack.i.h.bf16 %v1845_v50  ;;  %v1846_v41 = vunpack.i.l.bf16 %v1845_v50 }
 0x66e   :  { %v1850_v6 = vpop.permute.xlu0 %1849 }
 0x66f   :  { %v1852_v44 = vunpack.i.h.bf16 %v1850_v6  ;;  %v1851_v3 = vunpack.i.l.bf16 %v1850_v6 }
 0x671   :  { %v1114_v26 = vsel %vm414_vm13, %v562_v39, %v1852_v44  ;;  %v1113_v40 = vsel %vm414_vm13, %v559_v24, %v1851_v3 }
 0x68c   :  { %v1840_v35 = vpop.permute.xlu1 %1839 }
 0x68d   :  { %v1842_v8 = vunpack.i.h.bf16 %v1840_v35  ;;  %v1841_v58 = vunpack.i.l.bf16 %v1840_v35 }
 0x68f   :  { %v1117_v2 = vsel %vm1115_vm9, %v1112_v54, %v1842_v8  ;;  %v1116_v9 = vsel %vm1115_vm9, %v1111_v10, %v1841_v58  ;;  %v1763_v10 = vld [vmem:[%s2782_s17 + $0x8] sm:$0xff] }
 0x690   :  { %v1122_v17 = vsel %vm1120_vm11, %v1117_v2, %v1847_v52  ;;  %v1121_v28 = vsel %vm1120_vm11, %v1116_v9, %v1846_v41  ;;  %1314 = vmatpush.bf16.msrb.mxu2 %v1763_v10  ;;  %v1762_v9 = vld [vmem:[%s2782_s17] sm:$0xff] }
 0x691   :  { %v1125_v12 = vpack.c.bf16 %v1122_v17, %v1121_v28  ;;  %v1872_v10 = vld [vmem:[%s2783_s18] ss:$0 sm:$0xff] }
 0x693   :  { %1720 = vmatmul.msk.bf16.vlgmr.msra.gmra.mxu0 %vm210_vm10, %v1125_v12 }
 0x694   :  { %1315 = vmatpush.bf16.msrb.mxu2 %v1762_v9 }
 0x69c   :  { %v1855_v5 = vpop.permute.xlu1 %1854 }
 0x69d   :  { %v1857_v21 = vunpack.i.h.bf16 %v1855_v5  ;;  %v1856_v4 = vunpack.i.l.bf16 %v1855_v5 }
 0x69f   :  { %v1119_v53 = vsel %vm1115_vm9, %v1114_v26, %v1857_v21  ;;  %v1118_v32 = vsel %vm1115_vm9, %v1113_v40, %v1856_v4 }
 0x6a4   :  { %v1860_v18 = vpop.permute.xlu0 %1859 }
 0x6a5   :  { %v1862_v30 = vunpack.i.h.bf16 %v1860_v18  ;;  %v1861_v55 = vunpack.i.l.bf16 %v1860_v18 }
 0x6a7   :  { %v1123_v37 = vsel %vm1120_vm11, %v1118_v32, %v1861_v55  ;;  %v1124_v7 = vsel %vm1120_vm11, %v1119_v53, %v1862_v30 }
 0x6a8   :  { %v1126_v25 = vpack.c.bf16 %v1124_v7, %v1123_v37 }
 0x6aa   :  { %1721 = vmatmul.msk.bf16.gmra.mxu0 %vm210_vm10, %v1126_v25  ;;  %v1870_v25 = vld [vmem:[%s2780_s15] ss:$0 sm:$0xff] }
 0x710   :  { %v1162_v36 = vpop.f32.mrf.mxu0 }
 0x711   :  { %v1163_v27 = vadd.f32 %v1869_v34, %v1162_v36 }
 0x713   :  { %v1172_v24 = vadd.f32 %v1163_v27, %v2257_v15 }
 0x715   :  { %v1178_v39 = vsel %vm210_vm10, %v1172_v24, 0.0 }
 0x716   :  { %1179 = vadd.xlane.f32.xlu2 %v1178_v39 }
 0x718   :  { %v1164_v59 = vpop.f32.mrf.mxu0 }
 0x719   :  { %v1165_v33 = vadd.f32 %v1869_v34, %v1164_v59 }
 0x71b   :  { %v1173_v43 = vadd.f32 %v1165_v33, %v2259_v16 }
 0x71d   :  { %v1181_v13 = vsel %vm210_vm10, %v1173_v43, 0.0 }
 0x71e   :  { %1182 = vadd.xlane.f32.xlu1 %v1181_v13 }
 0x727   :  { %v1167_v60 = vpop.f32.mrf.mxu0 }
 0x728   :  { %v1168_v42 = vadd.f32 %v1869_v34, %v1167_v60 }
 0x72a   :  { %v1174_v47 = vadd.f32 %v1168_v42, %v2261_v19 }
 0x72c   :  { %v1184_v48 = vsel %vm210_vm10, %v1174_v47, 0.0 }
 0x72d   :  { %1185 = vadd.xlane.f32.xlu0 %v1184_v48 }
 0x72f   :  { %v1169_v45 = vpop.f32.mrf.mxu0 }
 0x730   :  { %v1170_v49 = vadd.f32 %v1869_v34, %v1169_v45 }
 0x732   :  { %v1175_v15 = vadd.f32 %v1170_v49, %v2263_v20 }
 0x734   :  { %v1187_v51 = vsel %vm210_vm10, %v1175_v15, 0.0 }
 0x735   :  { %1188 = vadd.xlane.f32.xlu2 %v1187_v51 }
 0x789   :  { %v1180_v11 = vpop.xlane.xlu2 %1179 }
 0x78a   :  { %v1190_v16 = vmul.f32 %v1180_v11, %v2211_v0 }
 0x78c   :  { %v1194_v23 = vsub.f32 %v1172_v24, %v1190_v16  ;;  %v1871_v24 = vld [vmem:[%s2781_s16] ss:$0 sm:$0xff] }
 0x78e   :  { %v1198_v61 = vmul.f32 %v1194_v23, %v1194_v23 }
 0x790   :  { %v1202_v31 = vsel %vm210_vm10, %v1198_v61, 0.0 }
 0x791   :  { %1203 = vadd.xlane.f32.xlu1 %v1202_v31  ;;  %v1183_v56 = vpop.xlane.xlu1 %1182 }
 0x792   :  { %v1191_v19 = vmul.f32 %v1183_v56, %v2211_v0 }
 0x794   :  { %v1195_v57 = vsub.f32 %v1173_v43, %v1191_v19 }
 0x796   :  { %v1199_v29 = vmul.f32 %v1195_v57, %v1195_v57 }
 0x798   :  { %v1205_v62 = vsel %vm210_vm10, %v1199_v29, 0.0 }
 0x799   :  { %1206 = vadd.xlane.f32.xlu0 %v1205_v62 }
 0x7a0   :  { %v1186_v20 = vpop.xlane.xlu0 %1185 }
 0x7a1   :  { %v1192_v38 = vmul.f32 %v1186_v20, %v2211_v0 }
 0x7a3   :  { %v2632_v63 = vsub.f32 %v1174_v47, %v1192_v38 }
 0x7a5   :  { %v1200_v1 = vmul.f32 %v2632_v63, %v2632_v63 }
 0x7a7   :  { %v1208_v46 = vsel %vm210_vm10, %v1200_v1, 0.0 }
 0x7a8   :  { %v1189_v50 = vpop.xlane.xlu2 %1188  ;;  %1209 = vadd.xlane.f32.xlu2 %v1208_v46 }
 0x7a9   :  { %v1193_v35 = vmul.f32 %v1189_v50, %v2211_v0 }
 0x7ab   :  { %v2638_v8 = vsub.f32 %v1175_v15, %v1193_v35 }
 0x7ad   :  { %v1201_v58 = vmul.f32 %v2638_v8, %v2638_v8 }
 0x7af   :  { %v1211_v54 = vsel %vm210_vm10, %v1201_v58, 0.0 }
 0x7b0   :  { %1212 = vadd.xlane.f32.xlu1 %v1211_v54  ;;  %v1765_v54 = vld [vmem:[%s2784_s19 + $0x8] sm:$0xff] }
 0x804   :  { %v1204_v52 = vpop.xlane.xlu1 %1203 }
 0x805   :  { %v1214_v41 = vmul.f32 %v1204_v52, %v2211_v0 }
 0x807   :  { %v1218_v2 = vadd.f32 1e-12, %v1214_v41  ;;  %v1764_v41 = vld [vmem:[%s2784_s19] sm:$0xff] }
 0x809   :  { %1951 = vrsqrt.f32 %v1218_v2  ;;  %vm1228_vm13 = vweird.f32 %v1218_v2 }
 0x80c   :  { %v1207_v17 = vpop.xlane.xlu0 %1206 }
 0x80d   :  { %v1215_v28 = vmul.f32 %v1207_v17, %v2211_v0 }
 0x80f   :  { %v1952_v12 = vpop.eup %1951  ;;  %v1219_v6 = vadd.f32 1e-12, %v1215_v28 }
 0x810   :  { %v1223_v5 = vmul.f32 %v1952_v12, %v1218_v2  ;;  %vm1229_vm12 = vweird.f32 %v1952_v12 }
 0x811   :  { %1953 = vrsqrt.f32 %v1219_v6  ;;  %vm1230_vm14 = vmor %vm1228_vm13, %vm1229_vm12  ;;  %vm1238_vm0 = vweird.f32 %v1219_v6 }
 0x812   :  { %v1224_v44 = vmul.f32 %v1952_v12, %v1223_v5 }
 0x814   :  { %v1225_v3 = vmul.f32 0.5, %v1224_v44 }
 0x816   :  { %v1226_v21 = vsub.f32 1.5, %v1225_v3 }
 0x817   :  { %v1954_v4 = vpop.eup %1953 }
 0x818   :  { %v1227_v18 = vmul.f32 %v1952_v12, %v1226_v21  ;;  %v1233_v26 = vmul.f32 %v1954_v4, %v1219_v6  ;;  %vm1239_vm15 = vweird.f32 %v1954_v4 }
 0x819   :  { %vm1240_vm1 = vmor %vm1238_vm0, %vm1239_vm15 }
 0x81a   :  { %v1234_v40 = vmul.f32 %v1954_v4, %v1233_v26  ;;  %v1231_v55 = vsel %vm1230_vm14, %v1952_v12, %v1227_v18 }
 0x81b   :  { %v1210_v30 = vpop.xlane.xlu2 %1209  ;;  %v1262_v34 = vmul.f32 %v1231_v55, %v1194_v23 }
 0x81c   :  { %v1235_v53 = vmul.f32 0.5, %v1234_v40  ;;  %v1216_v32 = vmul.f32 %v1210_v30, %v2211_v0 }
 0x81d   :  { %v1269_v39 = vmul.f32 %v1870_v25, %v1262_v34 }
 0x81e   :  { %v1236_v37 = vsub.f32 1.5, %v1235_v53  ;;  %v1220_v7 = vadd.f32 1e-12, %v1216_v32 }
 0x81f   :  { %v2659_v47 = vadd.f32 %v1871_v24, %v1269_v39 }
 0x820   :  { %v1237_v36 = vmul.f32 %v1954_v4, %v1236_v37  ;;  %1955 = vrsqrt.f32 %v1220_v7  ;;  %vm1248_vm3 = vweird.f32 %v1220_v7 }
 0x822   :  { %v1241_v27 = vsel %vm1240_vm1, %v1954_v4, %v1237_v36 }
 0x823   :  { %v1263_v59 = vmul.f32 %v1241_v27, %v1195_v57  ;;  %v1213_v33 = vpop.xlane.xlu1 %1212 }
 0x824   :  { %v1217_v43 = vmul.f32 %v1213_v33, %v2211_v0 }
 0x825   :  { %v1270_v13 = vmul.f32 %v1870_v25, %v1263_v59 }
 0x826   :  { %v1956_v60 = vpop.eup %1955  ;;  %v1221_v42 = vadd.f32 1e-12, %v1217_v43 }
 0x827   :  { %v2661_v48 = vadd.f32 %v1871_v24, %v1270_v13  ;;  %v1243_v45 = vmul.f32 %v1956_v60, %v1220_v7  ;;  %vm1249_vm2 = vweird.f32 %v1956_v60 }
 0x828   :  { %1957 = vrsqrt.f32 %v1221_v42  ;;  %vm1250_vm4 = vmor %vm1248_vm3, %vm1249_vm2  ;;  %vm1258_vm7 = vweird.f32 %v1221_v42 }
 0x829   :  { %v1244_v49 = vmul.f32 %v1956_v60, %v1243_v45  ;;  %v1280_v15 = vpack.c.bf16 %v2661_v48, %v2659_v47 }
 0x82b   :  { %v1245_v51 = vmul.f32 0.5, %v1244_v49  ;;  %1730 = vmatmul.msk.bf16.vlgmr.msrb.gmra.mxu2 %vm210_vm10, %v1280_v15 }
 0x82d   :  { %v1246_v11 = vsub.f32 1.5, %v1245_v51 }
 0x82e   :  { %v1958_v16 = vpop.eup %1957 }
 0x82f   :  { %v1247_v23 = vmul.f32 %v1956_v60, %v1246_v11  ;;  %v1253_v61 = vmul.f32 %v1958_v16, %v1221_v42  ;;  %vm1259_vm5 = vweird.f32 %v1958_v16 }
 0x830   :  { %vm1260_vm8 = vmor %vm1258_vm7, %vm1259_vm5 }
 0x831   :  { %v1254_v31 = vmul.f32 %v1958_v16, %v1253_v61  ;;  %v1251_v56 = vsel %vm1250_vm4, %v1956_v60, %v1247_v23 }
 0x832   :  { %v1264_v29 = vmul.f32 %v1251_v56, %v2632_v63  ;;  %v1767_v63 = vld [vmem:[%s2784_s19 + $0x18] sm:$0xff] }
 0x833   :  { %v1255_v19 = vmul.f32 0.5, %v1254_v31  ;;  %1411 = vmatpush.bf16.msrb.mxu1 %v1767_v63 }
 0x834   :  { %v1271_v1 = vmul.f32 %v1870_v25, %v1264_v29 }
 0x835   :  { %v1256_v57 = vsub.f32 1.5, %v1255_v19 }
 0x836   :  { %v2668_v50 = vadd.f32 %v1871_v24, %v1271_v1 }
 0x837   :  { %v1257_v62 = vmul.f32 %v1958_v16, %v1256_v57 }
 0x839   :  { %v1261_v20 = vsel %vm1260_vm8, %v1958_v16, %v1257_v62 }
 0x83a   :  { %v1265_v38 = vmul.f32 %v1261_v20, %v2638_v8  ;;  %v1766_v8 = vld [vmem:[%s2784_s19 + $0x10] sm:$0xff]  ;;  %v1873_v20 = vld [vmem:[%s2785_s20] ss:$0 sm:$0xff] }
 0x83b   :  { %1412 = vmatpush.bf16.msrb.mxu1 %v1766_v8 }
 0x83c   :  { %v1272_v46 = vmul.f32 %v1870_v25, %v1265_v38 }
 0x83e   :  { %v2670_v35 = vadd.f32 %v1871_v24, %v1272_v46 }
 0x83f   :  { %1413 = vmatpush.bf16.msrb.mxu1 %v1765_v54 }
 0x840   :  { %v1281_v58 = vpack.c.bf16 %v2670_v35, %v2668_v50 }
 0x842   :  { %1731 = vmatmul.msk.bf16.gmra.mxu2 %vm210_vm10, %v1281_v58 }
 0x843   :  { %1414 = vmatpush.bf16.msrb.mxu1 %v1764_v41 }
 0x8ae   :  { %v1317_v52 = vpop.f32.mrf.mxu2 }
 0x8af   :  { %v1318_v2 = vadd.f32 %v1872_v10, %v1317_v52 }
 0x8b1   :  { %v1327_v9 = vmul.f32 %v1318_v2, %v1318_v2 }
 0x8b3   :  { %v1331_v17 = vmul.f32 %v1327_v9, %v1318_v2 }
 0x8b5   :  { %v1335_v28 = vmul.f32 0.044715, %v1331_v17 }
 0x8b6   :  { %v1319_v12 = vpop.f32.mrf.mxu2 }
 0x8b7   :  { %v1339_v6 = vadd.f32 %v1335_v28, %v1318_v2  ;;  %v1320_v5 = vadd.f32 %v1872_v10, %v1319_v12 }
 0x8b9   :  { %v1343_v44 = vmul.f32 0.7978846, %v1339_v6  ;;  %v1328_v3 = vmul.f32 %v1320_v5, %v1320_v5 }
 0x8bb   :  { %v1332_v21 = vmul.f32 %v1328_v3, %v1320_v5  ;;  %1959 = vtanh.f32 %v1343_v44 }
 0x8bd   :  { %v1336_v4 = vmul.f32 0.044715, %v1332_v21 }
 0x8bf   :  { %v1340_v18 = vadd.f32 %v1336_v4, %v1320_v5 }
 0x8c1   :  { %v1344_v26 = vmul.f32 0.7978846, %v1340_v18  ;;  %v1960_v40 = vpop.eup %1959 }
 0x8c2   :  { %v1351_v55 = vadd.f32 1.0, %v1960_v40 }
 0x8c3   :  { %1961 = vtanh.f32 %v1344_v26 }
 0x8c4   :  { %v1355_v7 = vmul.f32 0.5, %v1351_v55 }
 0x8c5   :  { %v1322_v30 = vpop.f32.mrf.mxu2 }
 0x8c6   :  { %v1323_v53 = vadd.f32 %v1872_v10, %v1322_v30  ;;  %v1359_v39 = vmul.f32 %v1355_v7, %v1318_v2 }
 0x8c8   :  { %v1329_v32 = vmul.f32 %v1323_v53, %v1323_v53 }
 0x8c9   :  { %v1962_v37 = vpop.eup %1961 }
 0x8ca   :  { %v1352_v25 = vadd.f32 1.0, %v1962_v37  ;;  %v1333_v34 = vmul.f32 %v1329_v32, %v1323_v53 }
 0x8cc   :  { %v1356_v36 = vmul.f32 0.5, %v1352_v25  ;;  %v1337_v27 = vmul.f32 0.044715, %v1333_v34 }
 0x8cd   :  { %v1324_v24 = vpop.f32.mrf.mxu2 }
 0x8ce   :  { %v1360_v59 = vmul.f32 %v1356_v36, %v1320_v5  ;;  %v1341_v33 = vadd.f32 %v1337_v27, %v1323_v53  ;;  %v1325_v43 = vadd.f32 %v1872_v10, %v1324_v24 }
 0x8d0   :  { %v1363_v13 = vpack.c.bf16 %v1360_v59, %v1359_v39  ;;  %v1345_v60 = vmul.f32 0.7978846, %v1341_v33  ;;  %v1330_v42 = vmul.f32 %v1325_v43, %v1325_v43  ;;  %v1536_v39 = vshrl.u32 %v80_v14, 7  ;;  %v1876_v33 = vld [vmem:[%s2811_s1] ss:$0 sm:$0xff] }
 0x8d2   :  { %v1334_v45 = vmul.f32 %v1330_v42, %v1325_v43  ;;  %1748 = vmatmul.msk.bf16.vlgmr.msrb.gmra.mxu1 %vm178_vm6, %v1363_v13  ;;  %1963 = vtanh.f32 %v1345_v60 }
 0x8d4   :  { %v1338_v49 = vmul.f32 0.044715, %v1334_v45 }
 0x8d6   :  { %v1342_v15 = vadd.f32 %v1338_v49, %v1325_v43 }
 0x8d8   :  { %v1346_v51 = vmul.f32 0.7978846, %v1342_v15  ;;  %v1964_v11 = vpop.eup %1963 }
 0x8d9   :  { %v1353_v16 = vadd.f32 1.0, %v1964_v11 }
 0x8da   :  { %1965 = vtanh.f32 %v1346_v51 }
 0x8db   :  { %v1357_v31 = vmul.f32 0.5, %v1353_v16 }
 0x8dd   :  { %v1361_v19 = vmul.f32 %v1357_v31, %v1323_v53 }
 0x8e0   :  { %v1966_v23 = vpop.eup %1965 }
 0x8e1   :  { %v1354_v61 = vadd.f32 1.0, %v1966_v23 }
 0x8e3   :  { %v1358_v56 = vmul.f32 0.5, %v1354_v61 }
 0x8e5   :  { %v1362_v57 = vmul.f32 %v1358_v56, %v1325_v43  ;;  %v1537_v43 = vadd.s32 8, %v1536_v39 }
 0x8e7   :  { %v1364_v29 = vpack.c.bf16 %v1362_v57, %v1361_v19  ;;  %vm1540_vm9 = vcmp.eq.s32.totalorder %v1537_v43, %v1876_v33 }
 0x8e8   :  { %v2739_v14 = vsel %vm1540_vm9, 1.0, %v2006_v22 }
 0x8e9   :  { %1749 = vmatmul.msk.bf16.gmra.mxu1 %vm178_vm6, %v1364_v29  ;;  %vm1539_vm6 = vcmp.eq.s32.totalorder %v1536_v39, %v1876_v33  ;;  %v1548_v49 = vsel %vm210_vm10, %v2739_v14, 0.0 }
 0x8ea   :  { %v2734_v42 = vsel %vm1539_vm6, 1.0, %v2006_v22 }
 0x8eb   :  { %v1545_v45 = vsel %vm210_vm10, %v2734_v42, 0.0 }
 0x94f   :  { %v1416_v62 = vpop.f32.mrf.mxu1 }
 0x950   :  { %v1417_v9 = vadd.f32 %v1873_v20, %v1416_v62 }
 0x957   :  { %v1418_v38 = vpop.f32.mrf.mxu1 }
 0x958   :  { %v1419_v1 = vadd.f32 %v1873_v20, %v1418_v38 }
 0x95a   :  { %v1427_v46 = vadd.f32 %v1419_v1, %v2661_v48  ;;  %v1426_v48 = vadd.f32 %v1417_v9, %v2659_v47 }
 0x95c   :  { %v1435_v58 = vsel %vm210_vm10, %v1427_v46, 0.0  ;;  %v1432_v28 = vsel %vm210_vm10, %v1426_v48, 0.0 }
 0x95d   :  { %1436 = vadd.xlane.f32.xlu1 %v1435_v58 }
 0x966   :  { %v1421_v63 = vpop.f32.mrf.mxu1 }
 0x967   :  { %v1422_v8 = vadd.f32 %v1873_v20, %v1421_v63 }
 0x969   :  { %v1428_v54 = vadd.f32 %v1422_v8, %v2668_v50 }
 0x96b   :  { %v1438_v10 = vsel %vm210_vm10, %v1428_v54, 0.0 }
 0x96c   :  { %1439 = vadd.xlane.f32.xlu2 %v1438_v10 }
 0x96e   :  { %v1423_v52 = vpop.f32.mrf.mxu1 }
 0x96f   :  { %v1424_v41 = vadd.f32 %v1873_v20, %v1423_v52 }
 0x971   :  { %v1429_v2 = vadd.f32 %v1424_v41, %v2670_v35 }
 0x973   :  { %v1441_v17 = vsel %vm210_vm10, %v1429_v2, 0.0 }
 0x974   :  { %1442 = vadd.xlane.f32.xlu0 %v1441_v17 }
 0x97c   :  { %1433 = vadd.xlane.f32.xlu0 %v1432_v28 }
 0x9d0   :  { %v1437_v12 = vpop.xlane.xlu1 %1436 }
 0x9d1   :  { %v1445_v6 = vmul.f32 %v1437_v12, %v2211_v0 }
 0x9d3   :  { %v2704_v50 = vsub.f32 %v1427_v46, %v1445_v6  ;;  %v1874_v6 = vld [vmem:[%s2786_s21] ss:$0 sm:$0xff]  ;;  %s2023_s21 = smov [#allocation2]  }
 0x9d5   :  { %v1453_v5 = vmul.f32 %v2704_v50, %v2704_v50 }
 0x9d7   :  { %v1459_v44 = vsel %vm210_vm10, %v1453_v5, 0.0 }
 0x9d8   :  { %1460 = vadd.xlane.f32.xlu0 %v1459_v44 }
 0x9df   :  { %v1440_v35 = vpop.xlane.xlu2 %1439 }
 0x9e0   :  { %v1446_v3 = vmul.f32 %v1440_v35, %v2211_v0  ;;  %1549 = vadd.xlane.f32.xlu0 %v1548_v49 }
 0x9e2   :  { %v2710_v21 = vsub.f32 %v1428_v54, %v1446_v3  ;;  %v1875_v3 = vld [vmem:[%s2787_s22] ss:$0 sm:$0xff]  ;;  %s1618_s22 = sshll.u32 %s2023_s21, 4  ;;  %s1619_s22 = int_to_ptr.vmem [resolvable:$true] %s1618_s22 }
 0x9e4   :  { %v1454_v47 = vmul.f32 %v2710_v21, %v2710_v21 }
 0x9e6   :  { %v1462_v4 = vsel %vm210_vm10, %v1454_v47, 0.0 }
 0x9e7   :  { %v1443_v18 = vpop.xlane.xlu0 %1442  ;;  %1463 = vadd.xlane.f32.xlu1 %v1462_v4 }
 0x9e8   :  { %v1447_v26 = vmul.f32 %v1443_v18, %v2211_v0 }
 0x9ea   :  { %v2716_v40 = vsub.f32 %v1429_v2, %v1447_v26 }
 0x9ec   :  { %v1455_v30 = vmul.f32 %v2716_v40, %v2716_v40 }
 0x9ee   :  { %v1465_v55 = vsel %vm210_vm10, %v1455_v30, 0.0 }
 0x9ef   :  { %1466 = vadd.xlane.f32.xlu2 %v1465_v55  ;;  %v1434_v53 = vpop.xlane.xlu0 %1433  ;;  %1546 = vadd.xlane.f32.xlu1 %v1545_v45 }
 0x9f0   :  { %v1444_v32 = vmul.f32 %v1434_v53, %v2211_v0 }
 0x9f2   :  { %v2722_v37 = vsub.f32 %v1426_v48, %v1444_v32 }
 0x9f4   :  { %v1452_v7 = vmul.f32 %v2722_v37, %v2722_v37 }
 0x9f6   :  { %v1456_v25 = vsel %vm210_vm10, %v1452_v7, 0.0 }
 0x9f7   :  { %1457 = vadd.xlane.f32.xlu2 %v1456_v25 }
 0xa4b   :  { %v1461_v34 = vpop.xlane.xlu0 %1460 }
 0xa4c   :  { %v1469_v36 = vmul.f32 %v1461_v34, %v2211_v0 }
 0xa4e   :  { %v1473_v27 = vadd.f32 1e-12, %v1469_v36 }
 0xa50   :  { %1967 = vrsqrt.f32 %v1473_v27  ;;  %vm1492_vm15 = vweird.f32 %v1473_v27 }
 0xa53   :  { %v1550_v34 = vpop.xlane.xlu0 %1549 }
 0xa54   :  { %v1581_v36 = vmax.f32 %v1550_v34, 1.0 }
 0xa56   :  { %v1968_v60 = vpop.eup %1967 }
 0xa57   :  { %v1487_v15 = vmul.f32 %v1968_v60, %v1473_v27  ;;  %vm1493_vm12 = vweird.f32 %v1968_v60 }
 0xa58   :  { %vm1494_vm1 = vmor %vm1492_vm15, %vm1493_vm12  ;;  %vm1602_vm12 = vweird.f32 %v1581_v36 }
 0xa59   :  { %v1488_v61 = vmul.f32 %v1968_v60, %v1487_v15 }
 0xa5a   :  { %v1464_v24 = vpop.xlane.xlu1 %1463 }
 0xa5b   :  { %v1470_v59 = vmul.f32 %v1464_v24, %v2211_v0  ;;  %v1489_v19 = vmul.f32 0.5, %v1488_v61  ;;  %v1606_v61 = vand.u32 2147483647, %v1581_v36 }
 0xa5d   :  { %v1474_v13 = vadd.f32 1e-12, %v1470_v59  ;;  %v1490_v1 = vsub.f32 1.5, %v1489_v19  ;;  %vm1607_vm15 = vcmp.eq.f32.partialorder %v1606_v61, 8.507059e+37 }
 0xa5f   :  { %1969 = vrsqrt.f32 %v1474_v13  ;;  %v1491_v8 = vmul.f32 %v1968_v60, %v1490_v1  ;;  %vm1502_vm13 = vweird.f32 %v1474_v13 }
 0xa62   :  { %v1467_v51 = vpop.xlane.xlu2 %1466  ;;  %v1547_v7 = vpop.xlane.xlu1 %1546 }
 0xa63   :  { %v1471_v11 = vmul.f32 %v1467_v51, %v2211_v0  ;;  %v1580_v25 = vmax.f32 %v1547_v7, 1.0 }
 0xa65   :  { %v1970_v16 = vpop.eup %1969  ;;  %v1475_v23 = vadd.f32 1e-12, %v1471_v11  ;;  %vm1587_vm8 = vweird.f32 %v1580_v25  ;;  %v1593_v43 = vand.u32 2147483648, %v1580_v25  ;;  %v1608_v11 = vand.u32 2147483648, %v1581_v36 }
 0xa66   :  { %v1497_v31 = vmul.f32 %v1970_v16, %v1474_v13  ;;  %vm1503_vm11 = vweird.f32 %v1970_v16 }
 0xa67   :  { %1971 = vrsqrt.f32 %v1475_v23  ;;  %vm1504_vm14 = vmor %vm1502_vm13, %vm1503_vm11  ;;  %vm1512_vm2 = vweird.f32 %v1475_v23  ;;  %v1594_v45 = vor.u32 1.1754944e-38, %v1593_v43 }
 0xa68   :  { %v1498_v56 = vmul.f32 %v1970_v16, %v1497_v31  ;;  %v1609_v31 = vor.u32 1.1754944e-38, %v1608_v11 }
 0xa6a   :  { %v1499_v57 = vmul.f32 0.5, %v1498_v56  ;;  %v1458_v29 = vpop.xlane.xlu2 %1457 }
 0xa6b   :  { %v1468_v22 = vmul.f32 %v1458_v29, %v2211_v0  ;;  %v1495_v0 = vsel %vm1494_vm1, %v1968_v60, %v1491_v8  ;;  %v1591_v60 = vand.u32 2147483647, %v1580_v25 }
 0xa6c   :  { %v1500_v62 = vsub.f32 1.5, %v1499_v57  ;;  %v1517_v5 = vmul.f32 %v1495_v0, %v2704_v50 }
 0xa6d   :  { %v1972_v20 = vpop.eup %1971  ;;  %v1472_v38 = vadd.f32 1e-12, %v1468_v22  ;;  %vm1592_vm11 = vcmp.eq.f32.partialorder %v1591_v60, 8.507059e+37 }
 0xa6e   :  { %v1507_v46 = vmul.f32 %v1972_v20, %v1475_v23  ;;  %v1501_v58 = vmul.f32 %v1970_v16, %v1500_v62  ;;  %vm1513_vm0 = vweird.f32 %v1972_v20  ;;  %v1524_v18 = vmul.f32 %v1874_v6, %v1517_v5 }
 0xa6f   :  { %1973 = vrsqrt.f32 %v1472_v38  ;;  %vm1514_vm3 = vmor %vm1512_vm2, %vm1513_vm0  ;;  %vm1482_vm5 = vweird.f32 %v1472_v38 }
 0xa70   :  { %v1508_v63 = vmul.f32 %v1972_v20, %v1507_v46  ;;  %v1505_v10 = vsel %vm1504_vm14, %v1970_v16, %v1501_v58  ;;  %v1531_v55 = vadd.f32 %v1875_v3, %v1524_v18  ;;  %1975 = vrcp.f32 %v1580_v25 }
 0xa71   :  { %v1518_v17 = vmul.f32 %v1505_v10, %v2710_v21  ;;  %1977 = vrcp.f32 %v1581_v36 }
 0xa72   :  { %v1509_v54 = vmul.f32 0.5, %v1508_v63 }
 0xa73   :  { %v1525_v47 = vmul.f32 %v1874_v6, %v1518_v17 }
 0xa74   :  { %v1510_v52 = vsub.f32 1.5, %v1509_v54 }
 0xa75   :  { %v1974_v41 = vpop.eup %1973 }
 0xa76   :  { %v1511_v2 = vmul.f32 %v1972_v20, %v1510_v52  ;;  %v1477_v9 = vmul.f32 %v1974_v41, %v1472_v38  ;;  %vm1483_vm4 = vweird.f32 %v1974_v41  ;;  %v1976_v27 = vpop.eup %1975 }
 0xa77   :  { %vm1484_vm7 = vmor %vm1482_vm5, %vm1483_vm4  ;;  %v1583_v24 = vmul.f32 %v1976_v27, %v1580_v25  ;;  %vm1588_vm6 = vweird.f32 %v1976_v27 }
 0xa78   :  { %v1515_v48 = vsel %vm1514_vm3, %v1972_v20, %v1511_v2  ;;  %v1478_v28 = vmul.f32 %v1974_v41, %v1477_v9  ;;  %vm1589_vm9 = vmor %vm1587_vm8, %vm1588_vm6 }
 0xa79   :  { %v1519_v12 = vmul.f32 %v1515_v48, %v2716_v40  ;;  %v1532_v40 = vadd.f32 %v1875_v3, %v1525_v47  ;;  %v1584_v39 = vsub.f32 1.0, %v1583_v24 }
 0xa7a   :  { %v1479_v44 = vmul.f32 0.5, %v1478_v28 }
 0xa7b   :  { %v1526_v35 = vmul.f32 %v1874_v6, %v1519_v12  ;;  %v1585_v33 = vmul.f32 %v1976_v27, %v1584_v39 }
 0xa7c   :  { %v1480_v4 = vsub.f32 1.5, %v1479_v44 }
 0xa7d   :  { %v1533_v21 = vadd.f32 %v1875_v3, %v1526_v35  ;;  %v1586_v13 = vadd.f32 %v1976_v27, %v1585_v33 }
 0xa7e   :  { %v1481_v26 = vmul.f32 %v1974_v41, %v1480_v4 }
 0xa7f   :  { %1569 = vmatpush.msrb.mxu3 %v1533_v21 }
 0xa80   :  { %v1485_v30 = vsel %vm1484_vm7, %v1974_v41, %v1481_v26 }
 0xa81   :  { %1570 = vmatpush.msrb.mxu3 %v1532_v40  ;;  %v1516_v50 = vmul.f32 %v1485_v30, %v2722_v37  ;;  %v1978_v37 = vpop.eup %1977 }
 0xa82   :  { %v1598_v59 = vmul.f32 %v1978_v37, %v1581_v36  ;;  %vm1603_vm13 = vweird.f32 %v1978_v37 }
 0xa83   :  { %1571 = vmatpush.msrb.mxu3 %v1531_v55  ;;  %v1523_v53 = vmul.f32 %v1874_v6, %v1516_v50  ;;  %vm1604_vm14 = vmor %vm1602_vm12, %vm1603_vm13 }
 0xa85   :  { %v1530_v32 = vadd.f32 %v1875_v3, %v1523_v53 }
 0xa87   :  { %1572 = vmatpush.msrb.mxu3 %v1530_v32 }
 0xa88   :  { %1752 = vmatmul.msk.f32.vlgmr.msrb.gmra.mxu3 %vm210_vm10, %v2734_v42  ;;  %v1599_v42 = vsub.f32 1.0, %v1598_v59 }
 0xa8a   :  { %v1600_v49 = vmul.f32 %v1978_v37, %v1599_v42 }
 0xa8c   :  { %v1601_v23 = vadd.f32 %v1978_v37, %v1600_v49 }
 0xa8e   :  { %v1605_v56 = vsel %vm1604_vm14, %v1978_v37, %v1601_v23 }
 0xa8f   :  { %v1610_v57 = vsel %vm1607_vm15, %v1609_v31, %v1605_v56 }
 0xa90   :  { %1753 = vmatmul.msk.f32.gmra.mxu3 %vm210_vm10, %v2739_v14  ;;  %v1590_v14 = vsel %vm1589_vm9, %v1976_v27, %v1586_v13 }
 0xa91   :  { %v1595_v51 = vsel %vm1592_vm11, %v1594_v45, %v1590_v14 }
 0xb0b   :  { %v1574_v15 = vpop.f32.mrf.mxu3 }
 0xb0c   :  { %v1596_v16 = vmul.f32 %v1595_v51, %v1574_v15 }
 0xb0e   :  { %1612 = vst.msk [vmem:[#allocation2] sm:$0xff] %vm210_vm10, %v1596_v16 }
 0xb13   :  { %v1577_v19 = vpop.f32.mrf.mxu3 }
 0xb14   :  { %v1611_v29 = vmul.f32 %v1610_v57, %v1577_v19 }
 0xb16   :  { %1613 = vst.msk [vmem:[#allocation2 + $0x8] sm:$0xff] %vm210_vm10, %v1611_v29 }
 0xb17   :  { %1626 = dma.vmem_to_hbm [thread:$0]  %s1619_s22, 256, %s1621_s7, [#allocation3], %s2024_s28, %s2024_s28, %s2020_s24  }
 0xb18   :  { %2003 = dma.done.wait [#allocation3], 256  }
 0xb19   :  { %2004 = vsyncadd [#allocation3], 4294967040 }
 0xb1a   :  { %1631 = vsyncpa [#allocation3], 1 }

</bundles_post_ra>
